<compile_context>
chip_gen: v6e
topology: v6e:2x2x1
jax: 0.10.0
libtpu: 0.0.40
codegen_flags: <defaults>
</compile_context>

<pallas_src>
import functools

import numpy as np
import jax
import jax.numpy as jnp
from jax.experimental import pallas as pl
from jax.experimental.pallas import tpu as pltpu

PAD = 0
LN_EPS = 1e-5
VMEM_LIMIT = 32 * 1024 * 1024      # explicit scoped-VMEM budget (safe v5e/v6e/v7x)


# ----------------------------------------------------------------------------
# Fused multi-head attention block (projections + attention + out-proj + LN)
# ----------------------------------------------------------------------------
def _mha_kernel(qin_ref, kvin_ref, kpad_ref, npm_ref,
                wq_ref, bq_ref, wkv_ref, bkv_ref,
                fcw_ref, fcb_ref, lng_ref, lnb_ref,
                o_ref, *, n_head, d_k, d_v, causal, eps):
    f32 = jnp.float32
    bf16 = jnp.bfloat16

    qin = qin_ref[0]                       # (Lq, D) bf16
    kvin = kvin_ref[0]                     # (Lk, D) bf16
    Lq = qin.shape[0]
    Lk = kvin.shape[0]
    Hdk = n_head * d_k

    # Fused projections: bf16 x bf16 -> f32 accumulation on the MXU.
    # 1/sqrt(d_k) is already folded into wq/bq (prepare_params).
    q = jnp.dot(qin, wq_ref[...], preferred_element_type=f32) + bq_ref[...]
    kv = jnp.dot(kvin, wkv_ref[...], preferred_element_type=f32) + bkv_ref[...]
    k = kv[:, :Hdk]
    v = kv[:, Hdk:]

    # Attention mask built in-kernel: key padding (tiny (1,Lk) int input) plus
    # optional causal triangle via iota. Nothing scores-sized comes from HBM.
    mask = jnp.broadcast_to(kpad_ref[0] != 0, (Lq, Lk))
    if causal:
        row = jax.lax.broadcasted_iota(jnp.int32, (Lq, Lk), 0)
        col = jax.lax.broadcasted_iota(jnp.int32, (Lq, Lk), 1)
        mask = jnp.logical_or(mask, col > row)
    neg = jnp.float32(-1e30)

    out = None
    for h in range(n_head):                # static unroll over heads
        qh = q[:, h * d_k:(h + 1) * d_k].astype(bf16)
        kh = k[:, h * d_k:(h + 1) * d_k].astype(bf16)
        vh = v[:, h * d_v:(h + 1) * d_v].astype(bf16)
        s = jax.lax.dot_general(qh, kh, (((1,), (1,)), ((), ())),
                                preferred_element_type=f32)          # (Lq, Lk)
        # Fully-masked rows give a uniform softmax here (reference gives NaN);
        # both are zeroed by the non-pad mask below, so behavior matches.
        s = jnp.where(mask, neg, s)
        s = s - jnp.max(s, axis=-1, keepdims=True)
        p = jnp.exp(s)
        p = p * pl.reciprocal(jnp.sum(p, axis=-1, keepdims=True), approx=True)
        ctx = jnp.dot(p.astype(bf16), vh, preferred_element_type=f32)  # (Lq, dv)
        # fc(concat_h ctx_h) == sum_h ctx_h @ fc_w[h*dv:(h+1)*dv, :]
        part = jnp.dot(ctx.astype(bf16), fcw_ref[h * d_v:(h + 1) * d_v, :],
                       preferred_element_type=f32)                     # (Lq, D)
        out = part if out is None else out + part
    out = out + fcb_ref[...]

    # Fused epilogue: residual add + LayerNorm + non-pad mask (all f32).
    x = out + qin.astype(f32)
    mu = jnp.mean(x, axis=-1, keepdims=True)
    var = jnp.mean(jnp.square(x - mu), axis=-1, keepdims=True)
    y = (x - mu) * jax.lax.rsqrt(var + eps)
    y = y * lng_ref[...] + lnb_ref[...]
    y = y * npm_ref[0].astype(f32)
    o_ref[0] = y.astype(o_ref.dtype)


def mha_layer(p, q_in, kv_in, kpad, npm, cfg, causal):
    B, Lq, D = q_in.shape
    Lk = kv_in.shape[1]
    H, dk, dv = cfg["n_head"], cfg["d_k"], cfg["d_v"]

    def full(shape):
        return pl.BlockSpec(shape, lambda b: (0,) * len(shape))

    return pl.pallas_call(
        functools.partial(_mha_kernel, n_head=H, d_k=dk, d_v=dv,
                          causal=causal, eps=LN_EPS),
        out_shape=jax.ShapeDtypeStruct((B, Lq, D), jnp.bfloat16),
        grid=(B,),
        in_specs=[
            pl.BlockSpec((1, Lq, D), lambda b: (b, 0, 0)),    # query input
            pl.BlockSpec((1, Lk, D), lambda b: (b, 0, 0)),    # key/value input
            pl.BlockSpec((1, 1, Lk), lambda b: (b, 0, 0)),    # key pad mask
            pl.BlockSpec((1, Lq, 1), lambda b: (b, 0, 0)),    # non-pad mask
            full((D, H * dk)), full((1, H * dk)),             # Wq, bq (pre-scaled)
            full((D, H * (dk + dv))), full((1, H * (dk + dv))),  # fused Wkv, bkv
            full((H * dv, D)), full((1, D)),                  # Wfc, bfc
            full((1, D)), full((1, D)),                       # LN gamma, beta
        ],
        out_specs=pl.BlockSpec((1, Lq, D), lambda b: (b, 0, 0)),
        compiler_params=pltpu.CompilerParams(
            dimension_semantics=("parallel",),
            vmem_limit_bytes=VMEM_LIMIT),
    )(q_in, kv_in, kpad, npm, p["w_q"], p["b_q"], p["w_kv"], p["b_kv"],
      p["fc_w"], p["fc_b"], p["ln_g"], p["ln_b"])


# ----------------------------------------------------------------------------
# Fused position-wise FFN block (w1+ReLU -> w2 -> residual + LayerNorm)
# ----------------------------------------------------------------------------
def _ffn_kernel(x_ref, npm_ref, w1_ref, b1_ref, w2_ref, b2_ref,
                lng_ref, lnb_ref, o_ref, *, eps):
    f32 = jnp.float32
    x = x_ref[0]                                           # (L, D) bf16
    h = jnp.dot(x, w1_ref[...], preferred_element_type=f32) + b1_ref[...]
    h = jnp.maximum(h, 0.0)
    y = jnp.dot(h.astype(jnp.bfloat16), w2_ref[...],
                preferred_element_type=f32) + b2_ref[...]
    z = y + x.astype(f32)
    mu = jnp.mean(z, axis=-1, keepdims=True)
    var = jnp.mean(jnp.square(z - mu), axis=-1, keepdims=True)
    z = (z - mu) * jax.lax.rsqrt(var + eps)
    z = z * lng_ref[...] + lnb_ref[...]
    z = z * npm_ref[0].astype(f32)
    o_ref[0] = z.astype(o_ref.dtype)


def ffn_layer(p, x, npm, cfg):
    B, L, D = x.shape
    Dh = p["w1"].shape[1]

    def full(shape):
        return pl.BlockSpec(shape, lambda b: (0,) * len(shape))

    return pl.pallas_call(
        functools.partial(_ffn_kernel, eps=LN_EPS),
        out_shape=jax.ShapeDtypeStruct((B, L, D), jnp.bfloat16),
        grid=(B,),
        in_specs=[
            pl.BlockSpec((1, L, D), lambda b: (b, 0, 0)),
            pl.BlockSpec((1, L, 1), lambda b: (b, 0, 0)),
            full((D, Dh)), full((1, Dh)),
            full((Dh, D)), full((1, D)),
            full((1, D)), full((1, D)),
        ],
        out_specs=pl.BlockSpec((1, L, D), lambda b: (b, 0, 0)),
        compiler_params=pltpu.CompilerParams(
            dimension_semantics=("parallel",),
            vmem_limit_bytes=VMEM_LIMIT),
    )(x, npm, p["w1"], p["b1"], p["w2"], p["b2"], p["ln_g"], p["ln_b"])


# ----------------------------------------------------------------------------
# Tiled final vocab projection (Linear, bias=False like the reference)
# ----------------------------------------------------------------------------
def _proj_kernel(x_ref, w_ref, o_ref):
    o_ref[...] = jnp.dot(x_ref[...], w_ref[...],
                         preferred_element_type=jnp.float32).astype(o_ref.dtype)


def _pick_tile(dim, pref, align):
    if dim <= pref:
        return dim                        # single full block at small shapes
    return max(align, (pref // align) * align)


def projection(x, w, tm=256, tn=512):
    M, K = x.shape
    N = w.shape[1]
    tm = _pick_tile(M, tm, 8)
    tn = _pick_tile(N, tn, 128)
    grid = (pl.cdiv(M, tm), pl.cdiv(N, tn))
    return pl.pallas_call(
        _proj_kernel,
        out_shape=jax.ShapeDtypeStruct((M, N), jnp.float32),
        grid=grid,
        in_specs=[pl.BlockSpec((tm, K), lambda i, j: (i, 0)),
                  pl.BlockSpec((K, tn), lambda i, j: (0, j))],
        out_specs=pl.BlockSpec((tm, tn), lambda i, j: (i, j)),
        compiler_params=pltpu.CompilerParams(
            dimension_semantics=("parallel", "parallel"),
            vmem_limit_bytes=VMEM_LIMIT),
    )(x, w)


# ----------------------------------------------------------------------------
# Model glue (embeddings, tiny masks, layer composition) — plain JAX
# ----------------------------------------------------------------------------
def encoder(params, src_seq, src_pos, cfg):
    npm = (src_seq != PAD).astype(jnp.float32)[:, :, None]        # (B, Ls, 1)
    kpad = (src_seq == PAD).astype(jnp.int32)[:, None, :]         # (B, 1, Ls)
    x = (params["src_emb"][src_seq]
         + params["pos_table"][src_pos]).astype(jnp.bfloat16)
    for lp in params["enc_layers"]:
        x = mha_layer(lp["slf_attn"], x, x, kpad, npm, cfg, causal=False)
        x = ffn_layer(lp["ffn"], x, npm, cfg)
    return x


def decoder(params, tgt_seq, tgt_pos, src_seq, enc_out, cfg):
    npm = (tgt_seq != PAD).astype(jnp.float32)[:, :, None]        # (B, Lt, 1)
    tgt_kpad = (tgt_seq == PAD).astype(jnp.int32)[:, None, :]     # (B, 1, Lt)
    src_kpad = (src_seq == PAD).astype(jnp.int32)[:, None, :]     # (B, 1, Ls)
    x = (params["tgt_emb"][tgt_seq]
         + params["pos_table"][tgt_pos]).astype(jnp.bfloat16)
    for lp in params["dec_layers"]:
        x = mha_layer(lp["slf_attn"], x, x, tgt_kpad, npm, cfg, causal=True)
        x = mha_layer(lp["enc_attn"], x, enc_out, src_kpad, npm, cfg, causal=False)
        x = ffn_layer(lp["ffn"], x, npm, cfg)
    return x


def seq2seq_forward(params, src_seq, src_pos, tgt_seq, tgt_pos, cfg):
    # Transformer.forward: drop the last target token/position (teacher forcing).
    tgt_seq, tgt_pos = tgt_seq[:, :-1], tgt_pos[:, :-1]
    enc_out = encoder(params, src_seq, src_pos, cfg)
    dec_out = decoder(params, tgt_seq, tgt_pos, src_seq, enc_out, cfg)
    B, Lt, D = dec_out.shape
    # tgt_word_prj: Linear(d_model, tgt_vocab, bias=False); x_logit_scale = 1.
    logits = projection(dec_out.reshape(B * Lt, D), params["prj_w"])
    return logits                                                  # (B*Lt, V)


# ----------------------------------------------------------------------------
# Deterministic parameter initialization (+ one-time kernel-friendly prep)
# ----------------------------------------------------------------------------
def _sinusoid_table(n_position, d_hid):
    pos = np.arange(n_position)[:, None].astype(np.float64)
    i = np.arange(d_hid)[None, :].astype(np.float64)
    angle = pos / np.power(10000.0, 2.0 * (i // 2) / d_hid)
    table = np.zeros((n_position, d_hid), dtype=np.float64)
    table[:, 0::2] = np.sin(angle[:, 0::2])
    table[:, 1::2] = np.cos(angle[:, 1::2])
    table[0] = 0.0                                     # padding_idx row
    return jnp.asarray(table, dtype=jnp.float32)


def init_params(key, cfg):
    D, dk, dv, H, Dh = cfg["d_model"], cfg["d_k"], cfg["d_v"], cfg["n_head"], cfg["d_inner"]
    keys = iter(jax.random.split(key, 512))

    def nrm(shape, std=0.02):
        return std * jax.random.normal(next(keys), shape, dtype=jnp.float32)

    def mha():
        return dict(
            w_qs=nrm((D, H * dk)), b_qs=jnp.zeros((1, H * dk), jnp.float32),
            w_ks=nrm((D, H * dk)), b_ks=jnp.zeros((1, H * dk), jnp.float32),
            w_vs=nrm((D, H * dv)), b_vs=jnp.zeros((1, H * dv), jnp.float32),
            fc_w=nrm((H * dv, D)), fc_b=jnp.zeros((1, D), jnp.float32),
            ln_g=jnp.ones((1, D), jnp.float32), ln_b=jnp.zeros((1, D), jnp.float32),
        )

    def ffn():
        return dict(
            w1=nrm((D, Dh)), b1=jnp.zeros((1, Dh), jnp.float32),
            w2=nrm((Dh, D)), b2=jnp.zeros((1, D), jnp.float32),
            ln_g=jnp.ones((1, D), jnp.float32), ln_b=jnp.zeros((1, D), jnp.float32),
        )

    src_emb = nrm((cfg["src_vocab"], D)).at[PAD].set(0.0)     # padding_idx=0
    tgt_emb = nrm((cfg["tgt_vocab"], D)).at[PAD].set(0.0)
    pos_table = _sinusoid_table(cfg["max_seq"] + 1, D)

    return dict(
        src_emb=src_emb, tgt_emb=tgt_emb, pos_table=pos_table,
        enc_layers=[dict(slf_attn=mha(), ffn=ffn()) for _ in range(cfg["n_layers"])],
        dec_layers=[dict(slf_attn=mha(), enc_attn=mha(), ffn=ffn())
                    for _ in range(cfg["n_layers"])],
        prj_w=nrm((D, cfg["tgt_vocab"])),                      # bias=False
    )


def prepare_params(params, cfg):
    """One-time prep: fold 1/sqrt(d_k) into Wq/bq, fuse Wk|Wv, cast matmul
    weights and embeddings to bf16 (bias/LN params stay f32 for f32 epilogues)."""
    scale = jnp.float32(1.0 / np.sqrt(cfg["d_k"]))
    bf16 = jnp.bfloat16

    def prep_mha(m):
        return dict(
            w_q=(m["w_qs"] * scale).astype(bf16),
            b_q=(m["b_qs"] * scale).astype(jnp.float32),
            w_kv=jnp.concatenate([m["w_ks"], m["w_vs"]], axis=1).astype(bf16),
            b_kv=jnp.concatenate([m["b_ks"], m["b_vs"]], axis=1).astype(jnp.float32),
            fc_w=m["fc_w"].astype(bf16), fc_b=m["fc_b"].astype(jnp.float32),
            ln_g=m["ln_g"].astype(jnp.float32), ln_b=m["ln_b"].astype(jnp.float32),
        )

    def prep_ffn(f):
        return dict(
            w1=f["w1"].astype(bf16), b1=f["b1"].astype(jnp.float32),
            w2=f["w2"].astype(bf16), b2=f["b2"].astype(jnp.float32),
            ln_g=f["ln_g"].astype(jnp.float32), ln_b=f["ln_b"].astype(jnp.float32),
        )

    return dict(
        src_emb=params["src_emb"].astype(bf16),
        tgt_emb=params["tgt_emb"].astype(bf16),
        pos_table=params["pos_table"].astype(bf16),
        enc_layers=[dict(slf_attn=prep_mha(l["slf_attn"]), ffn=prep_ffn(l["ffn"]))
                    for l in params["enc_layers"]],
        dec_layers=[dict(slf_attn=prep_mha(l["slf_attn"]),
                         enc_attn=prep_mha(l["enc_attn"]),
                         ffn=prep_ffn(l["ffn"]))
                    for l in params["dec_layers"]],
        prj_w=params["prj_w"].astype(bf16),
    )


# ----------------------------------------------------------------------------
if __name__ == "__main__":
    cfg = dict(src_vocab=32, tgt_vocab=32, max_seq=8, d_model=32, d_inner=64,
               n_layers=2, n_head=2, d_k=16, d_v=16)

    key = jax.random.PRNGKey(0)
    pkey, k1, k2 = jax.random.split(key, 3)
    params = prepare_params(init_params(pkey, cfg), cfg)

    B, Ls, Lt = 2, 8, 8
    src_seq = jax.random.randint(k1, (B, Ls), 2, cfg["src_vocab"], dtype=jnp.int32)
    tgt_seq = jax.random.randint(k2, (B, Lt), 2, cfg["tgt_vocab"], dtype=jnp.int32)
    # trailing padding on the second batch element to exercise the masks
    src_seq = src_seq.at[1, 6:].set(PAD)
    tgt_seq = tgt_seq.at[1, 7:].set(PAD)
    src_pos = jnp.where(src_seq != PAD,
                        jnp.arange(1, Ls + 1, dtype=jnp.int32)[None, :], 0)
    tgt_pos = jnp.where(tgt_seq != PAD,
                        jnp.arange(1, Lt + 1, dtype=jnp.int32)[None, :], 0)

    fwd = jax.jit(lambda p, a, b, c, d: seq2seq_forward(p, a, b, c, d, cfg))
    out = fwd(params, src_seq, src_pos, tgt_seq, tgt_pos)
    out = jax.block_until_ready(out)

    assert out.shape == (B * (Lt - 1), cfg["tgt_vocab"]), out.shape
    assert bool(jnp.all(jnp.isfinite(out)))
    print("KERNEL_OK")
</pallas_src>

<mosaic_0001>
module attributes {stable_mosaic.version = 11 : i64} {
  func.func @_ffn_kernel(%arg0: i32, %arg1: memref<1x8x32xbf16, #tpu.memory_space<vmem>>, %arg2: memref<1x8x1xf32, #tpu.memory_space<vmem>>, %arg3: memref<32x64xbf16, #tpu.memory_space<vmem>>, %arg4: memref<1x64xf32, #tpu.memory_space<vmem>>, %arg5: memref<64x32xbf16, #tpu.memory_space<vmem>>, %arg6: memref<1x32xf32, #tpu.memory_space<vmem>>, %arg7: memref<1x32xf32, #tpu.memory_space<vmem>>, %arg8: memref<1x32xf32, #tpu.memory_space<vmem>>, %arg9: memref<1x8x32xbf16, #tpu.memory_space<vmem>>) attributes {dimension_semantics = [#tpu.dimension_semantics<parallel>], iteration_bounds = array<i64: 2>, scalar_prefetch = 0 : i64, scratch_operands = 0 : i64, tpu.core_type = #tpu.core_type<tc>, window_params = [{transform_indices = @transform_0, window_bounds = array<i64: 1, 8, 32>}, {transform_indices = @transform_1, window_bounds = array<i64: 1, 8, 1>}, {pipeline_mode = #tpu.pipeline_mode<synchronous>, transform_indices = @transform_2, window_bounds = array<i64: 32, 64>}, {pipeline_mode = #tpu.pipeline_mode<synchronous>, transform_indices = @transform_3, window_bounds = array<i64: 1, 64>}, {pipeline_mode = #tpu.pipeline_mode<synchronous>, transform_indices = @transform_4, window_bounds = array<i64: 64, 32>}, {pipeline_mode = #tpu.pipeline_mode<synchronous>, transform_indices = @transform_5, window_bounds = array<i64: 1, 32>}, {pipeline_mode = #tpu.pipeline_mode<synchronous>, transform_indices = @transform_6, window_bounds = array<i64: 1, 32>}, {pipeline_mode = #tpu.pipeline_mode<synchronous>, transform_indices = @transform_7, window_bounds = array<i64: 1, 32>}, {transform_indices = @transform_8, window_bounds = array<i64: 1, 8, 32>}]} {
    %c0 = arith.constant 0 : index
    %c0_0 = arith.constant 0 : index
    %c0_1 = arith.constant 0 : index
    %0 = vector.load %arg1[%c0, %c0_0, %c0_1] : memref<1x8x32xbf16, #tpu.memory_space<vmem>>, vector<1x8x32xbf16>
    %1 = vector.shape_cast %0 : vector<1x8x32xbf16> to vector<8x32xbf16>
    %c0_2 = arith.constant 0 : index
    %c0_3 = arith.constant 0 : index
    %2 = vector.load %arg3[%c0_2, %c0_3] : memref<32x64xbf16, #tpu.memory_space<vmem>>, vector<32x64xbf16>
    %cst = arith.constant dense<0.000000e+00> : vector<8x64xf32>
    %3 = tpu.matmul %1, %2, %cst {dimension_numbers = #tpu.dot_dimension_numbers<[1], [0], [0], [1], [0, 0, 1, 1], [], []>} : vector<8x32xbf16>, vector<32x64xbf16>, vector<8x64xf32> -> vector<8x64xf32>
    %c0_4 = arith.constant 0 : index
    %c0_5 = arith.constant 0 : index
    %4 = vector.load %arg4[%c0_4, %c0_5] : memref<1x64xf32, #tpu.memory_space<vmem>>, vector<1x64xf32>
    %5 = vector.broadcast %4 : vector<1x64xf32> to vector<8x64xf32>
    %6 = arith.addf %3, %5 : vector<8x64xf32>
    %cst_6 = arith.constant 0.000000e+00 : f32
    %7 = vector.broadcast %cst_6 : f32 to vector<8x64xf32>
    %8 = arith.maximumf %6, %7 : vector<8x64xf32>
    %9 = arith.truncf %8 : vector<8x64xf32> to vector<8x64xbf16>
    %c0_7 = arith.constant 0 : index
    %c0_8 = arith.constant 0 : index
    %10 = vector.load %arg5[%c0_7, %c0_8] : memref<64x32xbf16, #tpu.memory_space<vmem>>, vector<64x32xbf16>
    %cst_9 = arith.constant dense<0.000000e+00> : vector<8x32xf32>
    %11 = tpu.matmul %9, %10, %cst_9 {dimension_numbers = #tpu.dot_dimension_numbers<[1], [0], [0], [1], [0, 0, 1, 1], [], []>} : vector<8x64xbf16>, vector<64x32xbf16>, vector<8x32xf32> -> vector<8x32xf32>
    %c0_10 = arith.constant 0 : index
    %c0_11 = arith.constant 0 : index
    %12 = vector.load %arg6[%c0_10, %c0_11] : memref<1x32xf32, #tpu.memory_space<vmem>>, vector<1x32xf32>
    %13 = vector.broadcast %12 : vector<1x32xf32> to vector<8x32xf32>
    %14 = arith.addf %11, %13 : vector<8x32xf32>
    %15 = arith.extf %1 : vector<8x32xbf16> to vector<8x32xf32>
    %16 = arith.addf %14, %15 : vector<8x32xf32>
    %cst_12 = arith.constant dense<0.000000e+00> : vector<8xf32>
    %17 = vector.multi_reduction <add>, %16, %cst_12 [1] : vector<8x32xf32> to vector<8xf32>
    %18 = vector.shape_cast %17 : vector<8xf32> to vector<8x1xf32>
    %cst_13 = arith.constant 3.200000e+01 : f32
    %19 = vector.broadcast %cst_13 : f32 to vector<8x1xf32>
    %20 = arith.divf %18, %19 : vector<8x1xf32>
    %21 = vector.broadcast %20 : vector<8x1xf32> to vector<8x32xf32>
    %22 = arith.subf %16, %21 : vector<8x32xf32>
    %23 = arith.mulf %22, %22 : vector<8x32xf32>
    %cst_14 = arith.constant dense<0.000000e+00> : vector<8xf32>
    %24 = vector.multi_reduction <add>, %23, %cst_14 [1] : vector<8x32xf32> to vector<8xf32>
    %25 = vector.shape_cast %24 : vector<8xf32> to vector<8x1xf32>
    %cst_15 = arith.constant 3.200000e+01 : f32
    %26 = vector.broadcast %cst_15 : f32 to vector<8x1xf32>
    %27 = arith.divf %25, %26 : vector<8x1xf32>
    %28 = vector.broadcast %20 : vector<8x1xf32> to vector<8x32xf32>
    %29 = arith.subf %16, %28 : vector<8x32xf32>
    %cst_16 = arith.constant 9.99999974E-6 : f32
    %30 = vector.broadcast %cst_16 : f32 to vector<8x1xf32>
    %31 = arith.addf %27, %30 : vector<8x1xf32>
    %32 = math.rsqrt %31 : vector<8x1xf32>
    %33 = vector.broadcast %32 : vector<8x1xf32> to vector<8x32xf32>
    %34 = arith.mulf %29, %33 : vector<8x32xf32>
    %c0_17 = arith.constant 0 : index
    %c0_18 = arith.constant 0 : index
    %35 = vector.load %arg7[%c0_17, %c0_18] : memref<1x32xf32, #tpu.memory_space<vmem>>, vector<1x32xf32>
    %36 = vector.broadcast %35 : vector<1x32xf32> to vector<8x32xf32>
    %37 = arith.mulf %34, %36 : vector<8x32xf32>
    %c0_19 = arith.constant 0 : index
    %c0_20 = arith.constant 0 : index
    %38 = vector.load %arg8[%c0_19, %c0_20] : memref<1x32xf32, #tpu.memory_space<vmem>>, vector<1x32xf32>
    %39 = vector.broadcast %38 : vector<1x32xf32> to vector<8x32xf32>
    %40 = arith.addf %37, %39 : vector<8x32xf32>
    %c0_21 = arith.constant 0 : index
    %c0_22 = arith.constant 0 : index
    %c0_23 = arith.constant 0 : index
    %41 = vector.load %arg2[%c0_21, %c0_22, %c0_23] : memref<1x8x1xf32, #tpu.memory_space<vmem>>, vector<1x8x1xf32>
    %42 = vector.shape_cast %41 : vector<1x8x1xf32> to vector<8x1xf32>
    %43 = vector.broadcast %42 : vector<8x1xf32> to vector<8x32xf32>
    %44 = arith.mulf %40, %43 : vector<8x32xf32>
    %45 = arith.truncf %44 : vector<8x32xf32> to vector<8x32xbf16>
    %c0_24 = arith.constant 0 : index
    %c0_25 = arith.constant 0 : index
    %c0_26 = arith.constant 0 : index
    %46 = vector.load %arg9[%c0_24, %c0_25, %c0_26] : memref<1x8x32xbf16, #tpu.memory_space<vmem>>, vector<1x8x32xbf16>
    %47 = vector.shape_cast %46 : vector<1x8x32xbf16> to vector<8x32xbf16>
    %48 = vector.shape_cast %45 : vector<8x32xbf16> to vector<1x8x32xbf16>
    tpu.vector_store %arg9[%c0_24, %c0_25, %c0_26], %48 {strides = array<i32>} : memref<1x8x32xbf16, #tpu.memory_space<vmem>>, vector<1x8x32xbf16>,
    return
  }
  func.func @transform_0(%arg0: i32) -> (i32, i32, i32) {
    %c0_i32 = arith.constant 0 : i32
    %c0_i32_0 = arith.constant 0 : i32
    %c0_i32_1 = arith.constant 0 : i32
    return %arg0, %c0_i32, %c0_i32_0 : i32, i32, i32
  }
  func.func @transform_1(%arg0: i32) -> (i32, i32, i32) {
    %c0_i32 = arith.constant 0 : i32
    %c0_i32_0 = arith.constant 0 : i32
    %c0_i32_1 = arith.constant 0 : i32
    return %arg0, %c0_i32, %c0_i32_0 : i32, i32, i32
  }
  func.func @transform_2(%arg0: i32) -> (i32, i32) {
    %c0_i32 = arith.constant 0 : i32
    %c0_i32_0 = arith.constant 0 : i32
    %c0_i32_1 = arith.constant 0 : i32
    return %c0_i32, %c0_i32_0 : i32, i32
  }
  func.func @transform_3(%arg0: i32) -> (i32, i32) {
    %c0_i32 = arith.constant 0 : i32
    %c0_i32_0 = arith.constant 0 : i32
    %c0_i32_1 = arith.constant 0 : i32
    return %c0_i32, %c0_i32_0 : i32, i32
  }
  func.func @transform_4(%arg0: i32) -> (i32, i32) {
    %c0_i32 = arith.constant 0 : i32
    %c0_i32_0 = arith.constant 0 : i32
    %c0_i32_1 = arith.constant 0 : i32
    return %c0_i32, %c0_i32_0 : i32, i32
  }
  func.func @transform_5(%arg0: i32) -> (i32, i32) {
    %c0_i32 = arith.constant 0 : i32
    %c0_i32_0 = arith.constant 0 : i32
    %c0_i32_1 = arith.constant 0 : i32
    return %c0_i32, %c0_i32_0 : i32, i32
  }
  func.func @transform_6(%arg0: i32) -> (i32, i32) {
    %c0_i32 = arith.constant 0 : i32
    %c0_i32_0 = arith.constant 0 : i32
    %c0_i32_1 = arith.constant 0 : i32
    return %c0_i32, %c0_i32_0 : i32, i32
  }
  func.func @transform_7(%arg0: i32) -> (i32, i32) {
    %c0_i32 = arith.constant 0 : i32
    %c0_i32_0 = arith.constant 0 : i32
    %c0_i32_1 = arith.constant 0 : i32
    return %c0_i32, %c0_i32_0 : i32, i32
  }
  func.func @transform_8(%arg0: i32) -> (i32, i32, i32) {
    %c0_i32 = arith.constant 0 : i32
    %c0_i32_0 = arith.constant 0 : i32
    %c0_i32_1 = arith.constant 0 : i32
    return %arg0, %c0_i32, %c0_i32_0 : i32, i32, i32
  }
}

module attributes {stable_mosaic.version = 11 : i64} {
  func.func @_mha_kernel(%arg0: i32, %arg1: memref<1x8x32xbf16, #tpu.memory_space<vmem>>, %arg2: memref<1x8x32xbf16, #tpu.memory_space<vmem>>, %arg3: memref<1x1x8xi32, #tpu.memory_space<vmem>>, %arg4: memref<1x8x1xf32, #tpu.memory_space<vmem>>, %arg5: memref<32x32xbf16, #tpu.memory_space<vmem>>, %arg6: memref<1x32xf32, #tpu.memory_space<vmem>>, %arg7: memref<32x64xbf16, #tpu.memory_space<vmem>>, %arg8: memref<1x64xf32, #tpu.memory_space<vmem>>, %arg9: memref<32x32xbf16, #tpu.memory_space<vmem>>, %arg10: memref<1x32xf32, #tpu.memory_space<vmem>>, %arg11: memref<1x32xf32, #tpu.memory_space<vmem>>, %arg12: memref<1x32xf32, #tpu.memory_space<vmem>>, %arg13: memref<1x8x32xbf16, #tpu.memory_space<vmem>>) attributes {dimension_semantics = [#tpu.dimension_semantics<parallel>], iteration_bounds = array<i64: 2>, scalar_prefetch = 0 : i64, scratch_operands = 0 : i64, tpu.core_type = #tpu.core_type<tc>, window_params = [{transform_indices = @transform_0, window_bounds = array<i64: 1, 8, 32>}, {transform_indices = @transform_1, window_bounds = array<i64: 1, 8, 32>}, {transform_indices = @transform_2, window_bounds = array<i64: 1, 1, 8>}, {transform_indices = @transform_3, window_bounds = array<i64: 1, 8, 1>}, {pipeline_mode = #tpu.pipeline_mode<synchronous>, transform_indices = @transform_4, window_bounds = array<i64: 32, 32>}, {pipeline_mode = #tpu.pipeline_mode<synchronous>, transform_indices = @transform_5, window_bounds = array<i64: 1, 32>}, {pipeline_mode = #tpu.pipeline_mode<synchronous>, transform_indices = @transform_6, window_bounds = array<i64: 32, 64>}, {pipeline_mode = #tpu.pipeline_mode<synchronous>, transform_indices = @transform_7, window_bounds = array<i64: 1, 64>}, {pipeline_mode = #tpu.pipeline_mode<synchronous>, transform_indices = @transform_8, window_bounds = array<i64: 32, 32>}, {pipeline_mode = #tpu.pipeline_mode<synchronous>, transform_indices = @transform_9, window_bounds = array<i64: 1, 32>}, {pipeline_mode = #tpu.pipeline_mode<synchronous>, transform_indices = @transform_10, window_bounds = array<i64: 1, 32>}, {pipeline_mode = #tpu.pipeline_mode<synchronous>, transform_indices = @transform_11, window_bounds = array<i64: 1, 32>}, {transform_indices = @transform_12, window_bounds = array<i64: 1, 8, 32>}]} {
    %c0 = arith.constant 0 : index
    %c0_0 = arith.constant 0 : index
    %c0_1 = arith.constant 0 : index
    %0 = vector.load %arg1[%c0, %c0_0, %c0_1] : memref<1x8x32xbf16, #tpu.memory_space<vmem>>, vector<1x8x32xbf16>
    %1 = vector.shape_cast %0 : vector<1x8x32xbf16> to vector<8x32xbf16>
    %c0_2 = arith.constant 0 : index
    %c0_3 = arith.constant 0 : index
    %c0_4 = arith.constant 0 : index
    %2 = vector.load %arg2[%c0_2, %c0_3, %c0_4] : memref<1x8x32xbf16, #tpu.memory_space<vmem>>, vector<1x8x32xbf16>
    %3 = vector.shape_cast %2 : vector<1x8x32xbf16> to vector<8x32xbf16>
    %c0_5 = arith.constant 0 : index
    %c0_6 = arith.constant 0 : index
    %4 = vector.load %arg5[%c0_5, %c0_6] : memref<32x32xbf16, #tpu.memory_space<vmem>>, vector<32x32xbf16>
    %cst = arith.constant dense<0.000000e+00> : vector<8x32xf32>
    %5 = tpu.matmul %1, %4, %cst {dimension_numbers = #tpu.dot_dimension_numbers<[1], [0], [0], [1], [0, 0, 1, 1], [], []>} : vector<8x32xbf16>, vector<32x32xbf16>, vector<8x32xf32> -> vector<8x32xf32>
    %c0_7 = arith.constant 0 : index
    %c0_8 = arith.constant 0 : index
    %6 = vector.load %arg6[%c0_7, %c0_8] : memref<1x32xf32, #tpu.memory_space<vmem>>, vector<1x32xf32>
    %7 = vector.broadcast %6 : vector<1x32xf32> to vector<8x32xf32>
    %8 = arith.addf %5, %7 : vector<8x32xf32>
    %c0_9 = arith.constant 0 : index
    %c0_10 = arith.constant 0 : index
    %9 = vector.load %arg7[%c0_9, %c0_10] : memref<32x64xbf16, #tpu.memory_space<vmem>>, vector<32x64xbf16>
    %cst_11 = arith.constant dense<0.000000e+00> : vector<8x64xf32>
    %10 = tpu.matmul %3, %9, %cst_11 {dimension_numbers = #tpu.dot_dimension_numbers<[1], [0], [0], [1], [0, 0, 1, 1], [], []>} : vector<8x32xbf16>, vector<32x64xbf16>, vector<8x64xf32> -> vector<8x64xf32>
    %c0_12 = arith.constant 0 : index
    %c0_13 = arith.constant 0 : index
    %11 = vector.load %arg8[%c0_12, %c0_13] : memref<1x64xf32, #tpu.memory_space<vmem>>, vector<1x64xf32>
    %12 = vector.broadcast %11 : vector<1x64xf32> to vector<8x64xf32>
    %13 = arith.addf %10, %12 : vector<8x64xf32>
    %14 = vector.extract_strided_slice %13 {offsets = [0, 0], sizes = [8, 32], strides = [1, 1]} : vector<8x64xf32> to vector<8x32xf32>
    %15 = vector.extract_strided_slice %13 {offsets = [0, 32], sizes = [8, 32], strides = [1, 1]} : vector<8x64xf32> to vector<8x32xf32>
    %c0_14 = arith.constant 0 : index
    %c0_15 = arith.constant 0 : index
    %c0_16 = arith.constant 0 : index
    %16 = vector.load %arg3[%c0_14, %c0_15, %c0_16] : memref<1x1x8xi32, #tpu.memory_space<vmem>>, vector<1x1x8xi32>
    %17 = vector.shape_cast %16 : vector<1x1x8xi32> to vector<1x8xi32>
    %c0_i32 = arith.constant 0 : i32
    %18 = vector.broadcast %c0_i32 : i32 to vector<1x8xi32>
    %19 = arith.cmpi ne, %17, %18 : vector<1x8xi32>
    %20 = vector.shape_cast %19 : vector<1x8xi1> to vector<1x8xi1>
    %21 = vector.broadcast %20 : vector<1x8xi1> to vector<8x8xi1>
    %22 = vector.extract_strided_slice %8 {offsets = [0, 0], sizes = [8, 16], strides = [1, 1]} : vector<8x32xf32> to vector<8x16xf32>
    %23 = arith.truncf %22 : vector<8x16xf32> to vector<8x16xbf16>
    %24 = vector.extract_strided_slice %14 {offsets = [0, 0], sizes = [8, 16], strides = [1, 1]} : vector<8x32xf32> to vector<8x16xf32>
    %25 = arith.truncf %24 : vector<8x16xf32> to vector<8x16xbf16>
    %26 = vector.extract_strided_slice %15 {offsets = [0, 0], sizes = [8, 16], strides = [1, 1]} : vector<8x32xf32> to vector<8x16xf32>
    %27 = arith.truncf %26 : vector<8x16xf32> to vector<8x16xbf16>
    %cst_17 = arith.constant dense<0.000000e+00> : vector<8x8xf32>
    %28 = tpu.matmul %23, %25, %cst_17 {dimension_numbers = #tpu.dot_dimension_numbers<[1], [1], [0], [0], [0, 0, 1, 0], [], []>} : vector<8x16xbf16>, vector<8x16xbf16>, vector<8x8xf32> -> vector<8x8xf32>
    %cst_18 = arith.constant -1.000000e+30 : f32
    %29 = vector.broadcast %cst_18 : f32 to vector<8x8xf32>
    %30 = arith.select %21, %29, %28 : vector<8x8xi1>, vector<8x8xf32>
    %cst_19 = arith.constant dense<0xFF800000> : vector<8xf32>
    %31 = vector.multi_reduction <maximumf>, %30, %cst_19 [1] : vector<8x8xf32> to vector<8xf32>
    %32 = vector.shape_cast %31 : vector<8xf32> to vector<8x1xf32>
    %33 = vector.broadcast %32 : vector<8x1xf32> to vector<8x8xf32>
    %34 = arith.subf %30, %33 : vector<8x8xf32>
    %35 = math.exp %34 : vector<8x8xf32>
    %cst_20 = arith.constant dense<0.000000e+00> : vector<8xf32>
    %36 = vector.multi_reduction <add>, %35, %cst_20 [1] : vector<8x8xf32> to vector<8xf32>
    %37 = vector.shape_cast %36 : vector<8xf32> to vector<8x1xf32>
    %38 = tpu.reciprocal %37 {approx = true} : vector<8x1xf32> -> vector<8x1xf32>
    %39 = vector.broadcast %38 : vector<8x1xf32> to vector<8x8xf32>
    %40 = arith.mulf %35, %39 : vector<8x8xf32>
    %41 = arith.truncf %40 : vector<8x8xf32> to vector<8x8xbf16>
    %cst_21 = arith.constant dense<0.000000e+00> : vector<8x16xf32>
    %42 = tpu.matmul %41, %27, %cst_21 {dimension_numbers = #tpu.dot_dimension_numbers<[1], [0], [0], [1], [0, 0, 1, 1], [], []>} : vector<8x8xbf16>, vector<8x16xbf16>, vector<8x16xf32> -> vector<8x16xf32>
    %43 = arith.truncf %42 : vector<8x16xf32> to vector<8x16xbf16>
    %c0_22 = arith.constant 0 : index
    %c0_23 = arith.constant 0 : index
    %44 = vector.load %arg9[%c0_22, %c0_23] : memref<32x32xbf16, #tpu.memory_space<vmem>>, vector<16x32xbf16>
    %cst_24 = arith.constant dense<0.000000e+00> : vector<8x32xf32>
    %45 = tpu.matmul %43, %44, %cst_24 {dimension_numbers = #tpu.dot_dimension_numbers<[1], [0], [0], [1], [0, 0, 1, 1], [], []>} : vector<8x16xbf16>, vector<16x32xbf16>, vector<8x32xf32> -> vector<8x32xf32>
    %46 = vector.extract_strided_slice %8 {offsets = [0, 16], sizes = [8, 16], strides = [1, 1]} : vector<8x32xf32> to vector<8x16xf32>
    %47 = arith.truncf %46 : vector<8x16xf32> to vector<8x16xbf16>
    %48 = vector.extract_strided_slice %14 {offsets = [0, 16], sizes = [8, 16], strides = [1, 1]} : vector<8x32xf32> to vector<8x16xf32>
    %49 = arith.truncf %48 : vector<8x16xf32> to vector<8x16xbf16>
    %50 = vector.extract_strided_slice %15 {offsets = [0, 16], sizes = [8, 16], strides = [1, 1]} : vector<8x32xf32> to vector<8x16xf32>
    %51 = arith.truncf %50 : vector<8x16xf32> to vector<8x16xbf16>
    %cst_25 = arith.constant dense<0.000000e+00> : vector<8x8xf32>
    %52 = tpu.matmul %47, %49, %cst_25 {dimension_numbers = #tpu.dot_dimension_numbers<[1], [1], [0], [0], [0, 0, 1, 0], [], []>} : vector<8x16xbf16>, vector<8x16xbf16>, vector<8x8xf32> -> vector<8x8xf32>
    %cst_26 = arith.constant -1.000000e+30 : f32
    %53 = vector.broadcast %cst_26 : f32 to vector<8x8xf32>
    %54 = arith.select %21, %53, %52 : vector<8x8xi1>, vector<8x8xf32>
    %cst_27 = arith.constant dense<0xFF800000> : vector<8xf32>
    %55 = vector.multi_reduction <maximumf>, %54, %cst_27 [1] : vector<8x8xf32> to vector<8xf32>
    %56 = vector.shape_cast %55 : vector<8xf32> to vector<8x1xf32>
    %57 = vector.broadcast %56 : vector<8x1xf32> to vector<8x8xf32>
    %58 = arith.subf %54, %57 : vector<8x8xf32>
    %59 = math.exp %58 : vector<8x8xf32>
    %cst_28 = arith.constant dense<0.000000e+00> : vector<8xf32>
    %60 = vector.multi_reduction <add>, %59, %cst_28 [1] : vector<8x8xf32> to vector<8xf32>
    %61 = vector.shape_cast %60 : vector<8xf32> to vector<8x1xf32>
    %62 = tpu.reciprocal %61 {approx = true} : vector<8x1xf32> -> vector<8x1xf32>
    %63 = vector.broadcast %62 : vector<8x1xf32> to vector<8x8xf32>
    %64 = arith.mulf %59, %63 : vector<8x8xf32>
    %65 = arith.truncf %64 : vector<8x8xf32> to vector<8x8xbf16>
    %cst_29 = arith.constant dense<0.000000e+00> : vector<8x16xf32>
    %66 = tpu.matmul %65, %51, %cst_29 {dimension_numbers = #tpu.dot_dimension_numbers<[1], [0], [0], [1], [0, 0, 1, 1], [], []>} : vector<8x8xbf16>, vector<8x16xbf16>, vector<8x16xf32> -> vector<8x16xf32>
    %67 = arith.truncf %66 : vector<8x16xf32> to vector<8x16xbf16>
    %c16 = arith.constant 16 : index
    %c0_30 = arith.constant 0 : index
    %68 = vector.load %arg9[%c16, %c0_30] : memref<32x32xbf16, #tpu.memory_space<vmem>>, vector<16x32xbf16>
    %cst_31 = arith.constant dense<0.000000e+00> : vector<8x32xf32>
    %69 = tpu.matmul %67, %68, %cst_31 {dimension_numbers = #tpu.dot_dimension_numbers<[1], [0], [0], [1], [0, 0, 1, 1], [], []>} : vector<8x16xbf16>, vector<16x32xbf16>, vector<8x32xf32> -> vector<8x32xf32>
    %70 = arith.addf %45, %69 : vector<8x32xf32>
    %c0_32 = arith.constant 0 : index
    %c0_33 = arith.constant 0 : index
    %71 = vector.load %arg10[%c0_32, %c0_33] : memref<1x32xf32, #tpu.memory_space<vmem>>, vector<1x32xf32>
    %72 = vector.broadcast %71 : vector<1x32xf32> to vector<8x32xf32>
    %73 = arith.addf %70, %72 : vector<8x32xf32>
    %74 = arith.extf %1 : vector<8x32xbf16> to vector<8x32xf32>
    %75 = arith.addf %73, %74 : vector<8x32xf32>
    %cst_34 = arith.constant dense<0.000000e+00> : vector<8xf32>
    %76 = vector.multi_reduction <add>, %75, %cst_34 [1] : vector<8x32xf32> to vector<8xf32>
    %77 = vector.shape_cast %76 : vector<8xf32> to vector<8x1xf32>
    %cst_35 = arith.constant 3.200000e+01 : f32
    %78 = vector.broadcast %cst_35 : f32 to vector<8x1xf32>
    %79 = arith.divf %77, %78 : vector<8x1xf32>
    %80 = vector.broadcast %79 : vector<8x1xf32> to vector<8x32xf32>
    %81 = arith.subf %75, %80 : vector<8x32xf32>
    %82 = arith.mulf %81, %81 : vector<8x32xf32>
    %cst_36 = arith.constant dense<0.000000e+00> : vector<8xf32>
    %83 = vector.multi_reduction <add>, %82, %cst_36 [1] : vector<8x32xf32> to vector<8xf32>
    %84 = vector.shape_cast %83 : vector<8xf32> to vector<8x1xf32>
    %cst_37 = arith.constant 3.200000e+01 : f32
    %85 = vector.broadcast %cst_37 : f32 to vector<8x1xf32>
    %86 = arith.divf %84, %85 : vector<8x1xf32>
    %87 = vector.broadcast %79 : vector<8x1xf32> to vector<8x32xf32>
    %88 = arith.subf %75, %87 : vector<8x32xf32>
    %cst_38 = arith.constant 9.99999974E-6 : f32
    %89 = vector.broadcast %cst_38 : f32 to vector<8x1xf32>
    %90 = arith.addf %86, %89 : vector<8x1xf32>
    %91 = math.rsqrt %90 : vector<8x1xf32>
    %92 = vector.broadcast %91 : vector<8x1xf32> to vector<8x32xf32>
    %93 = arith.mulf %88, %92 : vector<8x32xf32>
    %c0_39 = arith.constant 0 : index
    %c0_40 = arith.constant 0 : index
    %94 = vector.load %arg11[%c0_39, %c0_40] : memref<1x32xf32, #tpu.memory_space<vmem>>, vector<1x32xf32>
    %95 = vector.broadcast %94 : vector<1x32xf32> to vector<8x32xf32>
    %96 = arith.mulf %93, %95 : vector<8x32xf32>
    %c0_41 = arith.constant 0 : index
    %c0_42 = arith.constant 0 : index
    %97 = vector.load %arg12[%c0_41, %c0_42] : memref<1x32xf32, #tpu.memory_space<vmem>>, vector<1x32xf32>
    %98 = vector.broadcast %97 : vector<1x32xf32> to vector<8x32xf32>
    %99 = arith.addf %96, %98 : vector<8x32xf32>
    %c0_43 = arith.constant 0 : index
    %c0_44 = arith.constant 0 : index
    %c0_45 = arith.constant 0 : index
    %100 = vector.load %arg4[%c0_43, %c0_44, %c0_45] : memref<1x8x1xf32, #tpu.memory_space<vmem>>, vector<1x8x1xf32>
    %101 = vector.shape_cast %100 : vector<1x8x1xf32> to vector<8x1xf32>
    %102 = vector.broadcast %101 : vector<8x1xf32> to vector<8x32xf32>
    %103 = arith.mulf %99, %102 : vector<8x32xf32>
    %104 = arith.truncf %103 : vector<8x32xf32> to vector<8x32xbf16>
    %c0_46 = arith.constant 0 : index
    %c0_47 = arith.constant 0 : index
    %c0_48 = arith.constant 0 : index
    %105 = vector.load %arg13[%c0_46, %c0_47, %c0_48] : memref<1x8x32xbf16, #tpu.memory_space<vmem>>, vector<1x8x32xbf16>
    %106 = vector.shape_cast %105 : vector<1x8x32xbf16> to vector<8x32xbf16>
    %107 = vector.shape_cast %104 : vector<8x32xbf16> to vector<1x8x32xbf16>
    tpu.vector_store %arg13[%c0_46, %c0_47, %c0_48], %107 {strides = array<i32>} : memref<1x8x32xbf16, #tpu.memory_space<vmem>>, vector<1x8x32xbf16>,
    return
  }
  func.func @transform_0(%arg0: i32) -> (i32, i32, i32) {
    %c0_i32 = arith.constant 0 : i32
    %c0_i32_0 = arith.constant 0 : i32
    %c0_i32_1 = arith.constant 0 : i32
    return %arg0, %c0_i32, %c0_i32_0 : i32, i32, i32
  }
  func.func @transform_1(%arg0: i32) -> (i32, i32, i32) {
    %c0_i32 = arith.constant 0 : i32
    %c0_i32_0 = arith.constant 0 : i32
    %c0_i32_1 = arith.constant 0 : i32
    return %arg0, %c0_i32, %c0_i32_0 : i32, i32, i32
  }
  func.func @transform_2(%arg0: i32) -> (i32, i32, i32) {
    %c0_i32 = arith.constant 0 : i32
    %c0_i32_0 = arith.constant 0 : i32
    %c0_i32_1 = arith.constant 0 : i32
    return %arg0, %c0_i32, %c0_i32_0 : i32, i32, i32
  }
  func.func @transform_3(%arg0: i32) -> (i32, i32, i32) {
    %c0_i32 = arith.constant 0 : i32
    %c0_i32_0 = arith.constant 0 : i32
    %c0_i32_1 = arith.constant 0 : i32
    return %arg0, %c0_i32, %c0_i32_0 : i32, i32, i32
  }
  func.func @transform_4(%arg0: i32) -> (i32, i32) {
    %c0_i32 = arith.constant 0 : i32
    %c0_i32_0 = arith.constant 0 : i32
    %c0_i32_1 = arith.constant 0 : i32
    return %c0_i32, %c0_i32_0 : i32, i32
  }
  func.func @transform_5(%arg0: i32) -> (i32, i32) {
    %c0_i32 = arith.constant 0 : i32
    %c0_i32_0 = arith.constant 0 : i32
    %c0_i32_1 = arith.constant 0 : i32
    return %c0_i32, %c0_i32_0 : i32, i32
  }
  func.func @transform_6(%arg0: i32) -> (i32, i32) {
    %c0_i32 = arith.constant 0 : i32
    %c0_i32_0 = arith.constant 0 : i32
    %c0_i32_1 = arith.constant 0 : i32
    return %c0_i32, %c0_i32_0 : i32, i32
  }
  func.func @transform_7(%arg0: i32) -> (i32, i32) {
    %c0_i32 = arith.constant 0 : i32
    %c0_i32_0 = arith.constant 0 : i32
    %c0_i32_1 = arith.constant 0 : i32
    return %c0_i32, %c0_i32_0 : i32, i32
  }
  func.func @transform_8(%arg0: i32) -> (i32, i32) {
    %c0_i32 = arith.constant 0 : i32
    %c0_i32_0 = arith.constant 0 : i32
    %c0_i32_1 = arith.constant 0 : i32
    return %c0_i32, %c0_i32_0 : i32, i32
  }
  func.func @transform_9(%arg0: i32) -> (i32, i32) {
    %c0_i32 = arith.constant 0 : i32
    %c0_i32_0 = arith.constant 0 : i32
    %c0_i32_1 = arith.constant 0 : i32
    return %c0_i32, %c0_i32_0 : i32, i32
  }
  func.func @transform_10(%arg0: i32) -> (i32, i32) {
    %c0_i32 = arith.constant 0 : i32
    %c0_i32_0 = arith.constant 0 : i32
    %c0_i32_1 = arith.constant 0 : i32
    return %c0_i32, %c0_i32_0 : i32, i32
  }
  func.func @transform_11(%arg0: i32) -> (i32, i32) {
    %c0_i32 = arith.constant 0 : i32
    %c0_i32_0 = arith.constant 0 : i32
    %c0_i32_1 = arith.constant 0 : i32
    return %c0_i32, %c0_i32_0 : i32, i32
  }
  func.func @transform_12(%arg0: i32) -> (i32, i32, i32) {
    %c0_i32 = arith.constant 0 : i32
    %c0_i32_0 = arith.constant 0 : i32
    %c0_i32_1 = arith.constant 0 : i32
    return %arg0, %c0_i32, %c0_i32_0 : i32, i32, i32
  }
}

module attributes {stable_mosaic.version = 11 : i64} {
  func.func @_mha_kernel(%arg0: i32, %arg1: memref<1x7x32xbf16, #tpu.memory_space<vmem>>, %arg2: memref<1x7x32xbf16, #tpu.memory_space<vmem>>, %arg3: memref<1x1x7xi32, #tpu.memory_space<vmem>>, %arg4: memref<1x7x1xf32, #tpu.memory_space<vmem>>, %arg5: memref<32x32xbf16, #tpu.memory_space<vmem>>, %arg6: memref<1x32xf32, #tpu.memory_space<vmem>>, %arg7: memref<32x64xbf16, #tpu.memory_space<vmem>>, %arg8: memref<1x64xf32, #tpu.memory_space<vmem>>, %arg9: memref<32x32xbf16, #tpu.memory_space<vmem>>, %arg10: memref<1x32xf32, #tpu.memory_space<vmem>>, %arg11: memref<1x32xf32, #tpu.memory_space<vmem>>, %arg12: memref<1x32xf32, #tpu.memory_space<vmem>>, %arg13: memref<1x7x32xbf16, #tpu.memory_space<vmem>>) attributes {dimension_semantics = [#tpu.dimension_semantics<parallel>], iteration_bounds = array<i64: 2>, scalar_prefetch = 0 : i64, scratch_operands = 0 : i64, tpu.core_type = #tpu.core_type<tc>, window_params = [{transform_indices = @transform_0, window_bounds = array<i64: 1, 7, 32>}, {transform_indices = @transform_1, window_bounds = array<i64: 1, 7, 32>}, {transform_indices = @transform_2, window_bounds = array<i64: 1, 1, 7>}, {transform_indices = @transform_3, window_bounds = array<i64: 1, 7, 1>}, {pipeline_mode = #tpu.pipeline_mode<synchronous>, transform_indices = @transform_4, window_bounds = array<i64: 32, 32>}, {pipeline_mode = #tpu.pipeline_mode<synchronous>, transform_indices = @transform_5, window_bounds = array<i64: 1, 32>}, {pipeline_mode = #tpu.pipeline_mode<synchronous>, transform_indices = @transform_6, window_bounds = array<i64: 32, 64>}, {pipeline_mode = #tpu.pipeline_mode<synchronous>, transform_indices = @transform_7, window_bounds = array<i64: 1, 64>}, {pipeline_mode = #tpu.pipeline_mode<synchronous>, transform_indices = @transform_8, window_bounds = array<i64: 32, 32>}, {pipeline_mode = #tpu.pipeline_mode<synchronous>, transform_indices = @transform_9, window_bounds = array<i64: 1, 32>}, {pipeline_mode = #tpu.pipeline_mode<synchronous>, transform_indices = @transform_10, window_bounds = array<i64: 1, 32>}, {pipeline_mode = #tpu.pipeline_mode<synchronous>, transform_indices = @transform_11, window_bounds = array<i64: 1, 32>}, {transform_indices = @transform_12, window_bounds = array<i64: 1, 7, 32>}]} {
    %c0 = arith.constant 0 : index
    %c0_0 = arith.constant 0 : index
    %c0_1 = arith.constant 0 : index
    %0 = vector.load %arg1[%c0, %c0_0, %c0_1] : memref<1x7x32xbf16, #tpu.memory_space<vmem>>, vector<1x7x32xbf16>
    %1 = vector.shape_cast %0 : vector<1x7x32xbf16> to vector<7x32xbf16>
    %c0_2 = arith.constant 0 : index
    %c0_3 = arith.constant 0 : index
    %c0_4 = arith.constant 0 : index
    %2 = vector.load %arg2[%c0_2, %c0_3, %c0_4] : memref<1x7x32xbf16, #tpu.memory_space<vmem>>, vector<1x7x32xbf16>
    %3 = vector.shape_cast %2 : vector<1x7x32xbf16> to vector<7x32xbf16>
    %c0_5 = arith.constant 0 : index
    %c0_6 = arith.constant 0 : index
    %4 = vector.load %arg5[%c0_5, %c0_6] : memref<32x32xbf16, #tpu.memory_space<vmem>>, vector<32x32xbf16>
    %cst = arith.constant dense<0.000000e+00> : vector<7x32xf32>
    %5 = tpu.matmul %1, %4, %cst {dimension_numbers = #tpu.dot_dimension_numbers<[1], [0], [0], [1], [0, 0, 1, 1], [], []>} : vector<7x32xbf16>, vector<32x32xbf16>, vector<7x32xf32> -> vector<7x32xf32>
    %c0_7 = arith.constant 0 : index
    %c0_8 = arith.constant 0 : index
    %6 = vector.load %arg6[%c0_7, %c0_8] : memref<1x32xf32, #tpu.memory_space<vmem>>, vector<1x32xf32>
    %7 = vector.broadcast %6 : vector<1x32xf32> to vector<7x32xf32>
    %8 = arith.addf %5, %7 : vector<7x32xf32>
    %c0_9 = arith.constant 0 : index
    %c0_10 = arith.constant 0 : index
    %9 = vector.load %arg7[%c0_9, %c0_10] : memref<32x64xbf16, #tpu.memory_space<vmem>>, vector<32x64xbf16>
    %cst_11 = arith.constant dense<0.000000e+00> : vector<7x64xf32>
    %10 = tpu.matmul %3, %9, %cst_11 {dimension_numbers = #tpu.dot_dimension_numbers<[1], [0], [0], [1], [0, 0, 1, 1], [], []>} : vector<7x32xbf16>, vector<32x64xbf16>, vector<7x64xf32> -> vector<7x64xf32>
    %c0_12 = arith.constant 0 : index
    %c0_13 = arith.constant 0 : index
    %11 = vector.load %arg8[%c0_12, %c0_13] : memref<1x64xf32, #tpu.memory_space<vmem>>, vector<1x64xf32>
    %12 = vector.broadcast %11 : vector<1x64xf32> to vector<7x64xf32>
    %13 = arith.addf %10, %12 : vector<7x64xf32>
    %14 = vector.extract_strided_slice %13 {offsets = [0, 0], sizes = [7, 32], strides = [1, 1]} : vector<7x64xf32> to vector<7x32xf32>
    %15 = vector.extract_strided_slice %13 {offsets = [0, 32], sizes = [7, 32], strides = [1, 1]} : vector<7x64xf32> to vector<7x32xf32>
    %c0_14 = arith.constant 0 : index
    %c0_15 = arith.constant 0 : index
    %c0_16 = arith.constant 0 : index
    %16 = vector.load %arg3[%c0_14, %c0_15, %c0_16] : memref<1x1x7xi32, #tpu.memory_space<vmem>>, vector<1x1x7xi32>
    %17 = vector.shape_cast %16 : vector<1x1x7xi32> to vector<1x7xi32>
    %c0_i32 = arith.constant 0 : i32
    %18 = vector.broadcast %c0_i32 : i32 to vector<1x7xi32>
    %19 = arith.cmpi ne, %17, %18 : vector<1x7xi32>
    %20 = vector.shape_cast %19 : vector<1x7xi1> to vector<1x7xi1>
    %21 = vector.broadcast %20 : vector<1x7xi1> to vector<7x7xi1>
    %22 = tpu.iota {dimensions = array<i32: 0>} : vector<7x7xi32>
    %23 = tpu.iota {dimensions = array<i32: 1>} : vector<7x7xi32>
    %24 = arith.cmpi sgt, %23, %22 : vector<7x7xi32>
    %25 = arith.ori %21, %24 : vector<7x7xi1>
    %26 = vector.extract_strided_slice %8 {offsets = [0, 0], sizes = [7, 16], strides = [1, 1]} : vector<7x32xf32> to vector<7x16xf32>
    %27 = arith.truncf %26 : vector<7x16xf32> to vector<7x16xbf16>
    %28 = vector.extract_strided_slice %14 {offsets = [0, 0], sizes = [7, 16], strides = [1, 1]} : vector<7x32xf32> to vector<7x16xf32>
    %29 = arith.truncf %28 : vector<7x16xf32> to vector<7x16xbf16>
    %30 = vector.extract_strided_slice %15 {offsets = [0, 0], sizes = [7, 16], strides = [1, 1]} : vector<7x32xf32> to vector<7x16xf32>
    %31 = arith.truncf %30 : vector<7x16xf32> to vector<7x16xbf16>
    %cst_17 = arith.constant dense<0.000000e+00> : vector<7x7xf32>
    %32 = tpu.matmul %27, %29, %cst_17 {dimension_numbers = #tpu.dot_dimension_numbers<[1], [1], [0], [0], [0, 0, 1, 0], [], []>} : vector<7x16xbf16>, vector<7x16xbf16>, vector<7x7xf32> -> vector<7x7xf32>
    %cst_18 = arith.constant -1.000000e+30 : f32
    %33 = vector.broadcast %cst_18 : f32 to vector<7x7xf32>
    %34 = arith.select %25, %33, %32 : vector<7x7xi1>, vector<7x7xf32>
    %cst_19 = arith.constant dense<0xFF800000> : vector<7xf32>
    %35 = vector.multi_reduction <maximumf>, %34, %cst_19 [1] : vector<7x7xf32> to vector<7xf32>
    %36 = vector.shape_cast %35 : vector<7xf32> to vector<7x1xf32>
    %37 = vector.broadcast %36 : vector<7x1xf32> to vector<7x7xf32>
    %38 = arith.subf %34, %37 : vector<7x7xf32>
    %39 = math.exp %38 : vector<7x7xf32>
    %cst_20 = arith.constant dense<0.000000e+00> : vector<7xf32>
    %40 = vector.multi_reduction <add>, %39, %cst_20 [1] : vector<7x7xf32> to vector<7xf32>
    %41 = vector.shape_cast %40 : vector<7xf32> to vector<7x1xf32>
    %42 = tpu.reciprocal %41 {approx = true} : vector<7x1xf32> -> vector<7x1xf32>
    %43 = vector.broadcast %42 : vector<7x1xf32> to vector<7x7xf32>
    %44 = arith.mulf %39, %43 : vector<7x7xf32>
    %45 = arith.truncf %44 : vector<7x7xf32> to vector<7x7xbf16>
    %cst_21 = arith.constant dense<0.000000e+00> : vector<7x16xf32>
    %46 = tpu.matmul %45, %31, %cst_21 {dimension_numbers = #tpu.dot_dimension_numbers<[1], [0], [0], [1], [0, 0, 1, 1], [], []>} : vector<7x7xbf16>, vector<7x16xbf16>, vector<7x16xf32> -> vector<7x16xf32>
    %47 = arith.truncf %46 : vector<7x16xf32> to vector<7x16xbf16>
    %c0_22 = arith.constant 0 : index
    %c0_23 = arith.constant 0 : index
    %48 = vector.load %arg9[%c0_22, %c0_23] : memref<32x32xbf16, #tpu.memory_space<vmem>>, vector<16x32xbf16>
    %cst_24 = arith.constant dense<0.000000e+00> : vector<7x32xf32>
    %49 = tpu.matmul %47, %48, %cst_24 {dimension_numbers = #tpu.dot_dimension_numbers<[1], [0], [0], [1], [0, 0, 1, 1], [], []>} : vector<7x16xbf16>, vector<16x32xbf16>, vector<7x32xf32> -> vector<7x32xf32>
    %50 = vector.extract_strided_slice %8 {offsets = [0, 16], sizes = [7, 16], strides = [1, 1]} : vector<7x32xf32> to vector<7x16xf32>
    %51 = arith.truncf %50 : vector<7x16xf32> to vector<7x16xbf16>
    %52 = vector.extract_strided_slice %14 {offsets = [0, 16], sizes = [7, 16], strides = [1, 1]} : vector<7x32xf32> to vector<7x16xf32>
    %53 = arith.truncf %52 : vector<7x16xf32> to vector<7x16xbf16>
    %54 = vector.extract_strided_slice %15 {offsets = [0, 16], sizes = [7, 16], strides = [1, 1]} : vector<7x32xf32> to vector<7x16xf32>
    %55 = arith.truncf %54 : vector<7x16xf32> to vector<7x16xbf16>
    %cst_25 = arith.constant dense<0.000000e+00> : vector<7x7xf32>
    %56 = tpu.matmul %51, %53, %cst_25 {dimension_numbers = #tpu.dot_dimension_numbers<[1], [1], [0], [0], [0, 0, 1, 0], [], []>} : vector<7x16xbf16>, vector<7x16xbf16>, vector<7x7xf32> -> vector<7x7xf32>
    %cst_26 = arith.constant -1.000000e+30 : f32
    %57 = vector.broadcast %cst_26 : f32 to vector<7x7xf32>
    %58 = arith.select %25, %57, %56 : vector<7x7xi1>, vector<7x7xf32>
    %cst_27 = arith.constant dense<0xFF800000> : vector<7xf32>
    %59 = vector.multi_reduction <maximumf>, %58, %cst_27 [1] : vector<7x7xf32> to vector<7xf32>
    %60 = vector.shape_cast %59 : vector<7xf32> to vector<7x1xf32>
    %61 = vector.broadcast %60 : vector<7x1xf32> to vector<7x7xf32>
    %62 = arith.subf %58, %61 : vector<7x7xf32>
    %63 = math.exp %62 : vector<7x7xf32>
    %cst_28 = arith.constant dense<0.000000e+00> : vector<7xf32>
    %64 = vector.multi_reduction <add>, %63, %cst_28 [1] : vector<7x7xf32> to vector<7xf32>
    %65 = vector.shape_cast %64 : vector<7xf32> to vector<7x1xf32>
    %66 = tpu.reciprocal %65 {approx = true} : vector<7x1xf32> -> vector<7x1xf32>
    %67 = vector.broadcast %66 : vector<7x1xf32> to vector<7x7xf32>
    %68 = arith.mulf %63, %67 : vector<7x7xf32>
    %69 = arith.truncf %68 : vector<7x7xf32> to vector<7x7xbf16>
    %cst_29 = arith.constant dense<0.000000e+00> : vector<7x16xf32>
    %70 = tpu.matmul %69, %55, %cst_29 {dimension_numbers = #tpu.dot_dimension_numbers<[1], [0], [0], [1], [0, 0, 1, 1], [], []>} : vector<7x7xbf16>, vector<7x16xbf16>, vector<7x16xf32> -> vector<7x16xf32>
    %71 = arith.truncf %70 : vector<7x16xf32> to vector<7x16xbf16>
    %c16 = arith.constant 16 : index
    %c0_30 = arith.constant 0 : index
    %72 = vector.load %arg9[%c16, %c0_30] : memref<32x32xbf16, #tpu.memory_space<vmem>>, vector<16x32xbf16>
    %cst_31 = arith.constant dense<0.000000e+00> : vector<7x32xf32>
    %73 = tpu.matmul %71, %72, %cst_31 {dimension_numbers = #tpu.dot_dimension_numbers<[1], [0], [0], [1], [0, 0, 1, 1], [], []>} : vector<7x16xbf16>, vector<16x32xbf16>, vector<7x32xf32> -> vector<7x32xf32>
    %74 = arith.addf %49, %73 : vector<7x32xf32>
    %c0_32 = arith.constant 0 : index
    %c0_33 = arith.constant 0 : index
    %75 = vector.load %arg10[%c0_32, %c0_33] : memref<1x32xf32, #tpu.memory_space<vmem>>, vector<1x32xf32>
    %76 = vector.broadcast %75 : vector<1x32xf32> to vector<7x32xf32>
    %77 = arith.addf %74, %76 : vector<7x32xf32>
    %78 = arith.extf %1 : vector<7x32xbf16> to vector<7x32xf32>
    %79 = arith.addf %77, %78 : vector<7x32xf32>
    %cst_34 = arith.constant dense<0.000000e+00> : vector<7xf32>
    %80 = vector.multi_reduction <add>, %79, %cst_34 [1] : vector<7x32xf32> to vector<7xf32>
    %81 = vector.shape_cast %80 : vector<7xf32> to vector<7x1xf32>
    %cst_35 = arith.constant 3.200000e+01 : f32
    %82 = vector.broadcast %cst_35 : f32 to vector<7x1xf32>
    %83 = arith.divf %81, %82 : vector<7x1xf32>
    %84 = vector.broadcast %83 : vector<7x1xf32> to vector<7x32xf32>
    %85 = arith.subf %79, %84 : vector<7x32xf32>
    %86 = arith.mulf %85, %85 : vector<7x32xf32>
    %cst_36 = arith.constant dense<0.000000e+00> : vector<7xf32>
    %87 = vector.multi_reduction <add>, %86, %cst_36 [1] : vector<7x32xf32> to vector<7xf32>
    %88 = vector.shape_cast %87 : vector<7xf32> to vector<7x1xf32>
    %cst_37 = arith.constant 3.200000e+01 : f32
    %89 = vector.broadcast %cst_37 : f32 to vector<7x1xf32>
    %90 = arith.divf %88, %89 : vector<7x1xf32>
    %91 = vector.broadcast %83 : vector<7x1xf32> to vector<7x32xf32>
    %92 = arith.subf %79, %91 : vector<7x32xf32>
    %cst_38 = arith.constant 9.99999974E-6 : f32
    %93 = vector.broadcast %cst_38 : f32 to vector<7x1xf32>
    %94 = arith.addf %90, %93 : vector<7x1xf32>
    %95 = math.rsqrt %94 : vector<7x1xf32>
    %96 = vector.broadcast %95 : vector<7x1xf32> to vector<7x32xf32>
    %97 = arith.mulf %92, %96 : vector<7x32xf32>
    %c0_39 = arith.constant 0 : index
    %c0_40 = arith.constant 0 : index
    %98 = vector.load %arg11[%c0_39, %c0_40] : memref<1x32xf32, #tpu.memory_space<vmem>>, vector<1x32xf32>
    %99 = vector.broadcast %98 : vector<1x32xf32> to vector<7x32xf32>
    %100 = arith.mulf %97, %99 : vector<7x32xf32>
    %c0_41 = arith.constant 0 : index
    %c0_42 = arith.constant 0 : index
    %101 = vector.load %arg12[%c0_41, %c0_42] : memref<1x32xf32, #tpu.memory_space<vmem>>, vector<1x32xf32>
    %102 = vector.broadcast %101 : vector<1x32xf32> to vector<7x32xf32>
    %103 = arith.addf %100, %102 : vector<7x32xf32>
    %c0_43 = arith.constant 0 : index
    %c0_44 = arith.constant 0 : index
    %c0_45 = arith.constant 0 : index
    %104 = vector.load %arg4[%c0_43, %c0_44, %c0_45] : memref<1x7x1xf32, #tpu.memory_space<vmem>>, vector<1x7x1xf32>
    %105 = vector.shape_cast %104 : vector<1x7x1xf32> to vector<7x1xf32>
    %106 = vector.broadcast %105 : vector<7x1xf32> to vector<7x32xf32>
    %107 = arith.mulf %103, %106 : vector<7x32xf32>
    %108 = arith.truncf %107 : vector<7x32xf32> to vector<7x32xbf16>
    %c0_46 = arith.constant 0 : index
    %c0_47 = arith.constant 0 : index
    %c0_48 = arith.constant 0 : index
    %109 = vector.load %arg13[%c0_46, %c0_47, %c0_48] : memref<1x7x32xbf16, #tpu.memory_space<vmem>>, vector<1x7x32xbf16>
    %110 = vector.shape_cast %109 : vector<1x7x32xbf16> to vector<7x32xbf16>
    %111 = vector.shape_cast %108 : vector<7x32xbf16> to vector<1x7x32xbf16>
    tpu.vector_store %arg13[%c0_46, %c0_47, %c0_48], %111 {strides = array<i32>} : memref<1x7x32xbf16, #tpu.memory_space<vmem>>, vector<1x7x32xbf16>,
    return
  }
  func.func @transform_0(%arg0: i32) -> (i32, i32, i32) {
    %c0_i32 = arith.constant 0 : i32
    %c0_i32_0 = arith.constant 0 : i32
    %c0_i32_1 = arith.constant 0 : i32
    return %arg0, %c0_i32, %c0_i32_0 : i32, i32, i32
  }
  func.func @transform_1(%arg0: i32) -> (i32, i32, i32) {
    %c0_i32 = arith.constant 0 : i32
    %c0_i32_0 = arith.constant 0 : i32
    %c0_i32_1 = arith.constant 0 : i32
    return %arg0, %c0_i32, %c0_i32_0 : i32, i32, i32
  }
  func.func @transform_2(%arg0: i32) -> (i32, i32, i32) {
    %c0_i32 = arith.constant 0 : i32
    %c0_i32_0 = arith.constant 0 : i32
    %c0_i32_1 = arith.constant 0 : i32
    return %arg0, %c0_i32, %c0_i32_0 : i32, i32, i32
  }
  func.func @transform_3(%arg0: i32) -> (i32, i32, i32) {
    %c0_i32 = arith.constant 0 : i32
    %c0_i32_0 = arith.constant 0 : i32
    %c0_i32_1 = arith.constant 0 : i32
    return %arg0, %c0_i32, %c0_i32_0 : i32, i32, i32
  }
  func.func @transform_4(%arg0: i32) -> (i32, i32) {
    %c0_i32 = arith.constant 0 : i32
    %c0_i32_0 = arith.constant 0 : i32
    %c0_i32_1 = arith.constant 0 : i32
    return %c0_i32, %c0_i32_0 : i32, i32
  }
  func.func @transform_5(%arg0: i32) -> (i32, i32) {
    %c0_i32 = arith.constant 0 : i32
    %c0_i32_0 = arith.constant 0 : i32
    %c0_i32_1 = arith.constant 0 : i32
    return %c0_i32, %c0_i32_0 : i32, i32
  }
  func.func @transform_6(%arg0: i32) -> (i32, i32) {
    %c0_i32 = arith.constant 0 : i32
    %c0_i32_0 = arith.constant 0 : i32
    %c0_i32_1 = arith.constant 0 : i32
    return %c0_i32, %c0_i32_0 : i32, i32
  }
  func.func @transform_7(%arg0: i32) -> (i32, i32) {
    %c0_i32 = arith.constant 0 : i32
    %c0_i32_0 = arith.constant 0 : i32
    %c0_i32_1 = arith.constant 0 : i32
    return %c0_i32, %c0_i32_0 : i32, i32
  }
  func.func @transform_8(%arg0: i32) -> (i32, i32) {
    %c0_i32 = arith.constant 0 : i32
    %c0_i32_0 = arith.constant 0 : i32
    %c0_i32_1 = arith.constant 0 : i32
    return %c0_i32, %c0_i32_0 : i32, i32
  }
  func.func @transform_9(%arg0: i32) -> (i32, i32) {
    %c0_i32 = arith.constant 0 : i32
    %c0_i32_0 = arith.constant 0 : i32
    %c0_i32_1 = arith.constant 0 : i32
    return %c0_i32, %c0_i32_0 : i32, i32
  }
  func.func @transform_10(%arg0: i32) -> (i32, i32) {
    %c0_i32 = arith.constant 0 : i32
    %c0_i32_0 = arith.constant 0 : i32
    %c0_i32_1 = arith.constant 0 : i32
    return %c0_i32, %c0_i32_0 : i32, i32
  }
  func.func @transform_11(%arg0: i32) -> (i32, i32) {
    %c0_i32 = arith.constant 0 : i32
    %c0_i32_0 = arith.constant 0 : i32
    %c0_i32_1 = arith.constant 0 : i32
    return %c0_i32, %c0_i32_0 : i32, i32
  }
  func.func @transform_12(%arg0: i32) -> (i32, i32, i32) {
    %c0_i32 = arith.constant 0 : i32
    %c0_i32_0 = arith.constant 0 : i32
    %c0_i32_1 = arith.constant 0 : i32
    return %arg0, %c0_i32, %c0_i32_0 : i32, i32, i32
  }
}

module attributes {stable_mosaic.version = 11 : i64} {
  func.func @_mha_kernel(%arg0: i32, %arg1: memref<1x7x32xbf16, #tpu.memory_space<vmem>>, %arg2: memref<1x8x32xbf16, #tpu.memory_space<vmem>>, %arg3: memref<1x1x8xi32, #tpu.memory_space<vmem>>, %arg4: memref<1x7x1xf32, #tpu.memory_space<vmem>>, %arg5: memref<32x32xbf16, #tpu.memory_space<vmem>>, %arg6: memref<1x32xf32, #tpu.memory_space<vmem>>, %arg7: memref<32x64xbf16, #tpu.memory_space<vmem>>, %arg8: memref<1x64xf32, #tpu.memory_space<vmem>>, %arg9: memref<32x32xbf16, #tpu.memory_space<vmem>>, %arg10: memref<1x32xf32, #tpu.memory_space<vmem>>, %arg11: memref<1x32xf32, #tpu.memory_space<vmem>>, %arg12: memref<1x32xf32, #tpu.memory_space<vmem>>, %arg13: memref<1x7x32xbf16, #tpu.memory_space<vmem>>) attributes {dimension_semantics = [#tpu.dimension_semantics<parallel>], iteration_bounds = array<i64: 2>, scalar_prefetch = 0 : i64, scratch_operands = 0 : i64, tpu.core_type = #tpu.core_type<tc>, window_params = [{transform_indices = @transform_0, window_bounds = array<i64: 1, 7, 32>}, {transform_indices = @transform_1, window_bounds = array<i64: 1, 8, 32>}, {transform_indices = @transform_2, window_bounds = array<i64: 1, 1, 8>}, {transform_indices = @transform_3, window_bounds = array<i64: 1, 7, 1>}, {pipeline_mode = #tpu.pipeline_mode<synchronous>, transform_indices = @transform_4, window_bounds = array<i64: 32, 32>}, {pipeline_mode = #tpu.pipeline_mode<synchronous>, transform_indices = @transform_5, window_bounds = array<i64: 1, 32>}, {pipeline_mode = #tpu.pipeline_mode<synchronous>, transform_indices = @transform_6, window_bounds = array<i64: 32, 64>}, {pipeline_mode = #tpu.pipeline_mode<synchronous>, transform_indices = @transform_7, window_bounds = array<i64: 1, 64>}, {pipeline_mode = #tpu.pipeline_mode<synchronous>, transform_indices = @transform_8, window_bounds = array<i64: 32, 32>}, {pipeline_mode = #tpu.pipeline_mode<synchronous>, transform_indices = @transform_9, window_bounds = array<i64: 1, 32>}, {pipeline_mode = #tpu.pipeline_mode<synchronous>, transform_indices = @transform_10, window_bounds = array<i64: 1, 32>}, {pipeline_mode = #tpu.pipeline_mode<synchronous>, transform_indices = @transform_11, window_bounds = array<i64: 1, 32>}, {transform_indices = @transform_12, window_bounds = array<i64: 1, 7, 32>}]} {
    %c0 = arith.constant 0 : index
    %c0_0 = arith.constant 0 : index
    %c0_1 = arith.constant 0 : index
    %0 = vector.load %arg1[%c0, %c0_0, %c0_1] : memref<1x7x32xbf16, #tpu.memory_space<vmem>>, vector<1x7x32xbf16>
    %1 = vector.shape_cast %0 : vector<1x7x32xbf16> to vector<7x32xbf16>
    %c0_2 = arith.constant 0 : index
    %c0_3 = arith.constant 0 : index
    %c0_4 = arith.constant 0 : index
    %2 = vector.load %arg2[%c0_2, %c0_3, %c0_4] : memref<1x8x32xbf16, #tpu.memory_space<vmem>>, vector<1x8x32xbf16>
    %3 = vector.shape_cast %2 : vector<1x8x32xbf16> to vector<8x32xbf16>
    %c0_5 = arith.constant 0 : index
    %c0_6 = arith.constant 0 : index
    %4 = vector.load %arg5[%c0_5, %c0_6] : memref<32x32xbf16, #tpu.memory_space<vmem>>, vector<32x32xbf16>
    %cst = arith.constant dense<0.000000e+00> : vector<7x32xf32>
    %5 = tpu.matmul %1, %4, %cst {dimension_numbers = #tpu.dot_dimension_numbers<[1], [0], [0], [1], [0, 0, 1, 1], [], []>} : vector<7x32xbf16>, vector<32x32xbf16>, vector<7x32xf32> -> vector<7x32xf32>
    %c0_7 = arith.constant 0 : index
    %c0_8 = arith.constant 0 : index
    %6 = vector.load %arg6[%c0_7, %c0_8] : memref<1x32xf32, #tpu.memory_space<vmem>>, vector<1x32xf32>
    %7 = vector.broadcast %6 : vector<1x32xf32> to vector<7x32xf32>
    %8 = arith.addf %5, %7 : vector<7x32xf32>
    %c0_9 = arith.constant 0 : index
    %c0_10 = arith.constant 0 : index
    %9 = vector.load %arg7[%c0_9, %c0_10] : memref<32x64xbf16, #tpu.memory_space<vmem>>, vector<32x64xbf16>
    %cst_11 = arith.constant dense<0.000000e+00> : vector<8x64xf32>
    %10 = tpu.matmul %3, %9, %cst_11 {dimension_numbers = #tpu.dot_dimension_numbers<[1], [0], [0], [1], [0, 0, 1, 1], [], []>} : vector<8x32xbf16>, vector<32x64xbf16>, vector<8x64xf32> -> vector<8x64xf32>
    %c0_12 = arith.constant 0 : index
    %c0_13 = arith.constant 0 : index
    %11 = vector.load %arg8[%c0_12, %c0_13] : memref<1x64xf32, #tpu.memory_space<vmem>>, vector<1x64xf32>
    %12 = vector.broadcast %11 : vector<1x64xf32> to vector<8x64xf32>
    %13 = arith.addf %10, %12 : vector<8x64xf32>
    %14 = vector.extract_strided_slice %13 {offsets = [0, 0], sizes = [8, 32], strides = [1, 1]} : vector<8x64xf32> to vector<8x32xf32>
    %15 = vector.extract_strided_slice %13 {offsets = [0, 32], sizes = [8, 32], strides = [1, 1]} : vector<8x64xf32> to vector<8x32xf32>
    %c0_14 = arith.constant 0 : index
    %c0_15 = arith.constant 0 : index
    %c0_16 = arith.constant 0 : index
    %16 = vector.load %arg3[%c0_14, %c0_15, %c0_16] : memref<1x1x8xi32, #tpu.memory_space<vmem>>, vector<1x1x8xi32>
    %17 = vector.shape_cast %16 : vector<1x1x8xi32> to vector<1x8xi32>
    %c0_i32 = arith.constant 0 : i32
    %18 = vector.broadcast %c0_i32 : i32 to vector<1x8xi32>
    %19 = arith.cmpi ne, %17, %18 : vector<1x8xi32>
    %20 = vector.shape_cast %19 : vector<1x8xi1> to vector<1x8xi1>
    %21 = vector.broadcast %20 : vector<1x8xi1> to vector<7x8xi1>
    %22 = vector.extract_strided_slice %8 {offsets = [0, 0], sizes = [7, 16], strides = [1, 1]} : vector<7x32xf32> to vector<7x16xf32>
    %23 = arith.truncf %22 : vector<7x16xf32> to vector<7x16xbf16>
    %24 = vector.extract_strided_slice %14 {offsets = [0, 0], sizes = [8, 16], strides = [1, 1]} : vector<8x32xf32> to vector<8x16xf32>
    %25 = arith.truncf %24 : vector<8x16xf32> to vector<8x16xbf16>
    %26 = vector.extract_strided_slice %15 {offsets = [0, 0], sizes = [8, 16], strides = [1, 1]} : vector<8x32xf32> to vector<8x16xf32>
    %27 = arith.truncf %26 : vector<8x16xf32> to vector<8x16xbf16>
    %cst_17 = arith.constant dense<0.000000e+00> : vector<7x8xf32>
    %28 = tpu.matmul %23, %25, %cst_17 {dimension_numbers = #tpu.dot_dimension_numbers<[1], [1], [0], [0], [0, 0, 1, 0], [], []>} : vector<7x16xbf16>, vector<8x16xbf16>, vector<7x8xf32> -> vector<7x8xf32>
    %cst_18 = arith.constant -1.000000e+30 : f32
    %29 = vector.broadcast %cst_18 : f32 to vector<7x8xf32>
    %30 = arith.select %21, %29, %28 : vector<7x8xi1>, vector<7x8xf32>
    %cst_19 = arith.constant dense<0xFF800000> : vector<7xf32>
    %31 = vector.multi_reduction <maximumf>, %30, %cst_19 [1] : vector<7x8xf32> to vector<7xf32>
    %32 = vector.shape_cast %31 : vector<7xf32> to vector<7x1xf32>
    %33 = vector.broadcast %32 : vector<7x1xf32> to vector<7x8xf32>
    %34 = arith.subf %30, %33 : vector<7x8xf32>
    %35 = math.exp %34 : vector<7x8xf32>
    %cst_20 = arith.constant dense<0.000000e+00> : vector<7xf32>
    %36 = vector.multi_reduction <add>, %35, %cst_20 [1] : vector<7x8xf32> to vector<7xf32>
    %37 = vector.shape_cast %36 : vector<7xf32> to vector<7x1xf32>
    %38 = tpu.reciprocal %37 {approx = true} : vector<7x1xf32> -> vector<7x1xf32>
    %39 = vector.broadcast %38 : vector<7x1xf32> to vector<7x8xf32>
    %40 = arith.mulf %35, %39 : vector<7x8xf32>
    %41 = arith.truncf %40 : vector<7x8xf32> to vector<7x8xbf16>
    %cst_21 = arith.constant dense<0.000000e+00> : vector<7x16xf32>
    %42 = tpu.matmul %41, %27, %cst_21 {dimension_numbers = #tpu.dot_dimension_numbers<[1], [0], [0], [1], [0, 0, 1, 1], [], []>} : vector<7x8xbf16>, vector<8x16xbf16>, vector<7x16xf32> -> vector<7x16xf32>
    %43 = arith.truncf %42 : vector<7x16xf32> to vector<7x16xbf16>
    %c0_22 = arith.constant 0 : index
    %c0_23 = arith.constant 0 : index
    %44 = vector.load %arg9[%c0_22, %c0_23] : memref<32x32xbf16, #tpu.memory_space<vmem>>, vector<16x32xbf16>
    %cst_24 = arith.constant dense<0.000000e+00> : vector<7x32xf32>
    %45 = tpu.matmul %43, %44, %cst_24 {dimension_numbers = #tpu.dot_dimension_numbers<[1], [0], [0], [1], [0, 0, 1, 1], [], []>} : vector<7x16xbf16>, vector<16x32xbf16>, vector<7x32xf32> -> vector<7x32xf32>
    %46 = vector.extract_strided_slice %8 {offsets = [0, 16], sizes = [7, 16], strides = [1, 1]} : vector<7x32xf32> to vector<7x16xf32>
    %47 = arith.truncf %46 : vector<7x16xf32> to vector<7x16xbf16>
    %48 = vector.extract_strided_slice %14 {offsets = [0, 16], sizes = [8, 16], strides = [1, 1]} : vector<8x32xf32> to vector<8x16xf32>
    %49 = arith.truncf %48 : vector<8x16xf32> to vector<8x16xbf16>
    %50 = vector.extract_strided_slice %15 {offsets = [0, 16], sizes = [8, 16], strides = [1, 1]} : vector<8x32xf32> to vector<8x16xf32>
    %51 = arith.truncf %50 : vector<8x16xf32> to vector<8x16xbf16>
    %cst_25 = arith.constant dense<0.000000e+00> : vector<7x8xf32>
    %52 = tpu.matmul %47, %49, %cst_25 {dimension_numbers = #tpu.dot_dimension_numbers<[1], [1], [0], [0], [0, 0, 1, 0], [], []>} : vector<7x16xbf16>, vector<8x16xbf16>, vector<7x8xf32> -> vector<7x8xf32>
    %cst_26 = arith.constant -1.000000e+30 : f32
    %53 = vector.broadcast %cst_26 : f32 to vector<7x8xf32>
    %54 = arith.select %21, %53, %52 : vector<7x8xi1>, vector<7x8xf32>
    %cst_27 = arith.constant dense<0xFF800000> : vector<7xf32>
    %55 = vector.multi_reduction <maximumf>, %54, %cst_27 [1] : vector<7x8xf32> to vector<7xf32>
    %56 = vector.shape_cast %55 : vector<7xf32> to vector<7x1xf32>
    %57 = vector.broadcast %56 : vector<7x1xf32> to vector<7x8xf32>
    %58 = arith.subf %54, %57 : vector<7x8xf32>
    %59 = math.exp %58 : vector<7x8xf32>
    %cst_28 = arith.constant dense<0.000000e+00> : vector<7xf32>
    %60 = vector.multi_reduction <add>, %59, %cst_28 [1] : vector<7x8xf32> to vector<7xf32>
    %61 = vector.shape_cast %60 : vector<7xf32> to vector<7x1xf32>
    %62 = tpu.reciprocal %61 {approx = true} : vector<7x1xf32> -> vector<7x1xf32>
    %63 = vector.broadcast %62 : vector<7x1xf32> to vector<7x8xf32>
    %64 = arith.mulf %59, %63 : vector<7x8xf32>
    %65 = arith.truncf %64 : vector<7x8xf32> to vector<7x8xbf16>
    %cst_29 = arith.constant dense<0.000000e+00> : vector<7x16xf32>
    %66 = tpu.matmul %65, %51, %cst_29 {dimension_numbers = #tpu.dot_dimension_numbers<[1], [0], [0], [1], [0, 0, 1, 1], [], []>} : vector<7x8xbf16>, vector<8x16xbf16>, vector<7x16xf32> -> vector<7x16xf32>
    %67 = arith.truncf %66 : vector<7x16xf32> to vector<7x16xbf16>
    %c16 = arith.constant 16 : index
    %c0_30 = arith.constant 0 : index
    %68 = vector.load %arg9[%c16, %c0_30] : memref<32x32xbf16, #tpu.memory_space<vmem>>, vector<16x32xbf16>
    %cst_31 = arith.constant dense<0.000000e+00> : vector<7x32xf32>
    %69 = tpu.matmul %67, %68, %cst_31 {dimension_numbers = #tpu.dot_dimension_numbers<[1], [0], [0], [1], [0, 0, 1, 1], [], []>} : vector<7x16xbf16>, vector<16x32xbf16>, vector<7x32xf32> -> vector<7x32xf32>
    %70 = arith.addf %45, %69 : vector<7x32xf32>
    %c0_32 = arith.constant 0 : index
    %c0_33 = arith.constant 0 : index
    %71 = vector.load %arg10[%c0_32, %c0_33] : memref<1x32xf32, #tpu.memory_space<vmem>>, vector<1x32xf32>
    %72 = vector.broadcast %71 : vector<1x32xf32> to vector<7x32xf32>
    %73 = arith.addf %70, %72 : vector<7x32xf32>
    %74 = arith.extf %1 : vector<7x32xbf16> to vector<7x32xf32>
    %75 = arith.addf %73, %74 : vector<7x32xf32>
    %cst_34 = arith.constant dense<0.000000e+00> : vector<7xf32>
    %76 = vector.multi_reduction <add>, %75, %cst_34 [1] : vector<7x32xf32> to vector<7xf32>
    %77 = vector.shape_cast %76 : vector<7xf32> to vector<7x1xf32>
    %cst_35 = arith.constant 3.200000e+01 : f32
    %78 = vector.broadcast %cst_35 : f32 to vector<7x1xf32>
    %79 = arith.divf %77, %78 : vector<7x1xf32>
    %80 = vector.broadcast %79 : vector<7x1xf32> to vector<7x32xf32>
    %81 = arith.subf %75, %80 : vector<7x32xf32>
    %82 = arith.mulf %81, %81 : vector<7x32xf32>
    %cst_36 = arith.constant dense<0.000000e+00> : vector<7xf32>
    %83 = vector.multi_reduction <add>, %82, %cst_36 [1] : vector<7x32xf32> to vector<7xf32>
    %84 = vector.shape_cast %83 : vector<7xf32> to vector<7x1xf32>
    %cst_37 = arith.constant 3.200000e+01 : f32
    %85 = vector.broadcast %cst_37 : f32 to vector<7x1xf32>
    %86 = arith.divf %84, %85 : vector<7x1xf32>
    %87 = vector.broadcast %79 : vector<7x1xf32> to vector<7x32xf32>
    %88 = arith.subf %75, %87 : vector<7x32xf32>
    %cst_38 = arith.constant 9.99999974E-6 : f32
    %89 = vector.broadcast %cst_38 : f32 to vector<7x1xf32>
    %90 = arith.addf %86, %89 : vector<7x1xf32>
    %91 = math.rsqrt %90 : vector<7x1xf32>
    %92 = vector.broadcast %91 : vector<7x1xf32> to vector<7x32xf32>
    %93 = arith.mulf %88, %92 : vector<7x32xf32>
    %c0_39 = arith.constant 0 : index
    %c0_40 = arith.constant 0 : index
    %94 = vector.load %arg11[%c0_39, %c0_40] : memref<1x32xf32, #tpu.memory_space<vmem>>, vector<1x32xf32>
    %95 = vector.broadcast %94 : vector<1x32xf32> to vector<7x32xf32>
    %96 = arith.mulf %93, %95 : vector<7x32xf32>
    %c0_41 = arith.constant 0 : index
    %c0_42 = arith.constant 0 : index
    %97 = vector.load %arg12[%c0_41, %c0_42] : memref<1x32xf32, #tpu.memory_space<vmem>>, vector<1x32xf32>
    %98 = vector.broadcast %97 : vector<1x32xf32> to vector<7x32xf32>
    %99 = arith.addf %96, %98 : vector<7x32xf32>
    %c0_43 = arith.constant 0 : index
    %c0_44 = arith.constant 0 : index
    %c0_45 = arith.constant 0 : index
    %100 = vector.load %arg4[%c0_43, %c0_44, %c0_45] : memref<1x7x1xf32, #tpu.memory_space<vmem>>, vector<1x7x1xf32>
    %101 = vector.shape_cast %100 : vector<1x7x1xf32> to vector<7x1xf32>
    %102 = vector.broadcast %101 : vector<7x1xf32> to vector<7x32xf32>
    %103 = arith.mulf %99, %102 : vector<7x32xf32>
    %104 = arith.truncf %103 : vector<7x32xf32> to vector<7x32xbf16>
    %c0_46 = arith.constant 0 : index
    %c0_47 = arith.constant 0 : index
    %c0_48 = arith.constant 0 : index
    %105 = vector.load %arg13[%c0_46, %c0_47, %c0_48] : memref<1x7x32xbf16, #tpu.memory_space<vmem>>, vector<1x7x32xbf16>
    %106 = vector.shape_cast %105 : vector<1x7x32xbf16> to vector<7x32xbf16>
    %107 = vector.shape_cast %104 : vector<7x32xbf16> to vector<1x7x32xbf16>
    tpu.vector_store %arg13[%c0_46, %c0_47, %c0_48], %107 {strides = array<i32>} : memref<1x7x32xbf16, #tpu.memory_space<vmem>>, vector<1x7x32xbf16>,
    return
  }
  func.func @transform_0(%arg0: i32) -> (i32, i32, i32) {
    %c0_i32 = arith.constant 0 : i32
    %c0_i32_0 = arith.constant 0 : i32
    %c0_i32_1 = arith.constant 0 : i32
    return %arg0, %c0_i32, %c0_i32_0 : i32, i32, i32
  }
  func.func @transform_1(%arg0: i32) -> (i32, i32, i32) {
    %c0_i32 = arith.constant 0 : i32
    %c0_i32_0 = arith.constant 0 : i32
    %c0_i32_1 = arith.constant 0 : i32
    return %arg0, %c0_i32, %c0_i32_0 : i32, i32, i32
  }
  func.func @transform_2(%arg0: i32) -> (i32, i32, i32) {
    %c0_i32 = arith.constant 0 : i32
    %c0_i32_0 = arith.constant 0 : i32
    %c0_i32_1 = arith.constant 0 : i32
    return %arg0, %c0_i32, %c0_i32_0 : i32, i32, i32
  }
  func.func @transform_3(%arg0: i32) -> (i32, i32, i32) {
    %c0_i32 = arith.constant 0 : i32
    %c0_i32_0 = arith.constant 0 : i32
    %c0_i32_1 = arith.constant 0 : i32
    return %arg0, %c0_i32, %c0_i32_0 : i32, i32, i32
  }
  func.func @transform_4(%arg0: i32) -> (i32, i32) {
    %c0_i32 = arith.constant 0 : i32
    %c0_i32_0 = arith.constant 0 : i32
    %c0_i32_1 = arith.constant 0 : i32
    return %c0_i32, %c0_i32_0 : i32, i32
  }
  func.func @transform_5(%arg0: i32) -> (i32, i32) {
    %c0_i32 = arith.constant 0 : i32
    %c0_i32_0 = arith.constant 0 : i32
    %c0_i32_1 = arith.constant 0 : i32
    return %c0_i32, %c0_i32_0 : i32, i32
  }
  func.func @transform_6(%arg0: i32) -> (i32, i32) {
    %c0_i32 = arith.constant 0 : i32
    %c0_i32_0 = arith.constant 0 : i32
    %c0_i32_1 = arith.constant 0 : i32
    return %c0_i32, %c0_i32_0 : i32, i32
  }
  func.func @transform_7(%arg0: i32) -> (i32, i32) {
    %c0_i32 = arith.constant 0 : i32
    %c0_i32_0 = arith.constant 0 : i32
    %c0_i32_1 = arith.constant 0 : i32
    return %c0_i32, %c0_i32_0 : i32, i32
  }
  func.func @transform_8(%arg0: i32) -> (i32, i32) {
    %c0_i32 = arith.constant 0 : i32
    %c0_i32_0 = arith.constant 0 : i32
    %c0_i32_1 = arith.constant 0 : i32
    return %c0_i32, %c0_i32_0 : i32, i32
  }
  func.func @transform_9(%arg0: i32) -> (i32, i32) {
    %c0_i32 = arith.constant 0 : i32
    %c0_i32_0 = arith.constant 0 : i32
    %c0_i32_1 = arith.constant 0 : i32
    return %c0_i32, %c0_i32_0 : i32, i32
  }
  func.func @transform_10(%arg0: i32) -> (i32, i32) {
    %c0_i32 = arith.constant 0 : i32
    %c0_i32_0 = arith.constant 0 : i32
    %c0_i32_1 = arith.constant 0 : i32
    return %c0_i32, %c0_i32_0 : i32, i32
  }
  func.func @transform_11(%arg0: i32) -> (i32, i32) {
    %c0_i32 = arith.constant 0 : i32
    %c0_i32_0 = arith.constant 0 : i32
    %c0_i32_1 = arith.constant 0 : i32
    return %c0_i32, %c0_i32_0 : i32, i32
  }
  func.func @transform_12(%arg0: i32) -> (i32, i32, i32) {
    %c0_i32 = arith.constant 0 : i32
    %c0_i32_0 = arith.constant 0 : i32
    %c0_i32_1 = arith.constant 0 : i32
    return %arg0, %c0_i32, %c0_i32_0 : i32, i32, i32
  }
}

module attributes {stable_mosaic.version = 11 : i64} {
  func.func @_ffn_kernel(%arg0: i32, %arg1: memref<1x7x32xbf16, #tpu.memory_space<vmem>>, %arg2: memref<1x7x1xf32, #tpu.memory_space<vmem>>, %arg3: memref<32x64xbf16, #tpu.memory_space<vmem>>, %arg4: memref<1x64xf32, #tpu.memory_space<vmem>>, %arg5: memref<64x32xbf16, #tpu.memory_space<vmem>>, %arg6: memref<1x32xf32, #tpu.memory_space<vmem>>, %arg7: memref<1x32xf32, #tpu.memory_space<vmem>>, %arg8: memref<1x32xf32, #tpu.memory_space<vmem>>, %arg9: memref<1x7x32xbf16, #tpu.memory_space<vmem>>) attributes {dimension_semantics = [#tpu.dimension_semantics<parallel>], iteration_bounds = array<i64: 2>, scalar_prefetch = 0 : i64, scratch_operands = 0 : i64, tpu.core_type = #tpu.core_type<tc>, window_params = [{transform_indices = @transform_0, window_bounds = array<i64: 1, 7, 32>}, {transform_indices = @transform_1, window_bounds = array<i64: 1, 7, 1>}, {pipeline_mode = #tpu.pipeline_mode<synchronous>, transform_indices = @transform_2, window_bounds = array<i64: 32, 64>}, {pipeline_mode = #tpu.pipeline_mode<synchronous>, transform_indices = @transform_3, window_bounds = array<i64: 1, 64>}, {pipeline_mode = #tpu.pipeline_mode<synchronous>, transform_indices = @transform_4, window_bounds = array<i64: 64, 32>}, {pipeline_mode = #tpu.pipeline_mode<synchronous>, transform_indices = @transform_5, window_bounds = array<i64: 1, 32>}, {pipeline_mode = #tpu.pipeline_mode<synchronous>, transform_indices = @transform_6, window_bounds = array<i64: 1, 32>}, {pipeline_mode = #tpu.pipeline_mode<synchronous>, transform_indices = @transform_7, window_bounds = array<i64: 1, 32>}, {transform_indices = @transform_8, window_bounds = array<i64: 1, 7, 32>}]} {
    %c0 = arith.constant 0 : index
    %c0_0 = arith.constant 0 : index
    %c0_1 = arith.constant 0 : index
    %0 = vector.load %arg1[%c0, %c0_0, %c0_1] : memref<1x7x32xbf16, #tpu.memory_space<vmem>>, vector<1x7x32xbf16>
    %1 = vector.shape_cast %0 : vector<1x7x32xbf16> to vector<7x32xbf16>
    %c0_2 = arith.constant 0 : index
    %c0_3 = arith.constant 0 : index
    %2 = vector.load %arg3[%c0_2, %c0_3] : memref<32x64xbf16, #tpu.memory_space<vmem>>, vector<32x64xbf16>
    %cst = arith.constant dense<0.000000e+00> : vector<7x64xf32>
    %3 = tpu.matmul %1, %2, %cst {dimension_numbers = #tpu.dot_dimension_numbers<[1], [0], [0], [1], [0, 0, 1, 1], [], []>} : vector<7x32xbf16>, vector<32x64xbf16>, vector<7x64xf32> -> vector<7x64xf32>
    %c0_4 = arith.constant 0 : index
    %c0_5 = arith.constant 0 : index
    %4 = vector.load %arg4[%c0_4, %c0_5] : memref<1x64xf32, #tpu.memory_space<vmem>>, vector<1x64xf32>
    %5 = vector.broadcast %4 : vector<1x64xf32> to vector<7x64xf32>
    %6 = arith.addf %3, %5 : vector<7x64xf32>
    %cst_6 = arith.constant 0.000000e+00 : f32
    %7 = vector.broadcast %cst_6 : f32 to vector<7x64xf32>
    %8 = arith.maximumf %6, %7 : vector<7x64xf32>
    %9 = arith.truncf %8 : vector<7x64xf32> to vector<7x64xbf16>
    %c0_7 = arith.constant 0 : index
    %c0_8 = arith.constant 0 : index
    %10 = vector.load %arg5[%c0_7, %c0_8] : memref<64x32xbf16, #tpu.memory_space<vmem>>, vector<64x32xbf16>
    %cst_9 = arith.constant dense<0.000000e+00> : vector<7x32xf32>
    %11 = tpu.matmul %9, %10, %cst_9 {dimension_numbers = #tpu.dot_dimension_numbers<[1], [0], [0], [1], [0, 0, 1, 1], [], []>} : vector<7x64xbf16>, vector<64x32xbf16>, vector<7x32xf32> -> vector<7x32xf32>
    %c0_10 = arith.constant 0 : index
    %c0_11 = arith.constant 0 : index
    %12 = vector.load %arg6[%c0_10, %c0_11] : memref<1x32xf32, #tpu.memory_space<vmem>>, vector<1x32xf32>
    %13 = vector.broadcast %12 : vector<1x32xf32> to vector<7x32xf32>
    %14 = arith.addf %11, %13 : vector<7x32xf32>
    %15 = arith.extf %1 : vector<7x32xbf16> to vector<7x32xf32>
    %16 = arith.addf %14, %15 : vector<7x32xf32>
    %cst_12 = arith.constant dense<0.000000e+00> : vector<7xf32>
    %17 = vector.multi_reduction <add>, %16, %cst_12 [1] : vector<7x32xf32> to vector<7xf32>
    %18 = vector.shape_cast %17 : vector<7xf32> to vector<7x1xf32>
    %cst_13 = arith.constant 3.200000e+01 : f32
    %19 = vector.broadcast %cst_13 : f32 to vector<7x1xf32>
    %20 = arith.divf %18, %19 : vector<7x1xf32>
    %21 = vector.broadcast %20 : vector<7x1xf32> to vector<7x32xf32>
    %22 = arith.subf %16, %21 : vector<7x32xf32>
    %23 = arith.mulf %22, %22 : vector<7x32xf32>
    %cst_14 = arith.constant dense<0.000000e+00> : vector<7xf32>
    %24 = vector.multi_reduction <add>, %23, %cst_14 [1] : vector<7x32xf32> to vector<7xf32>
    %25 = vector.shape_cast %24 : vector<7xf32> to vector<7x1xf32>
    %cst_15 = arith.constant 3.200000e+01 : f32
    %26 = vector.broadcast %cst_15 : f32 to vector<7x1xf32>
    %27 = arith.divf %25, %26 : vector<7x1xf32>
    %28 = vector.broadcast %20 : vector<7x1xf32> to vector<7x32xf32>
    %29 = arith.subf %16, %28 : vector<7x32xf32>
    %cst_16 = arith.constant 9.99999974E-6 : f32
    %30 = vector.broadcast %cst_16 : f32 to vector<7x1xf32>
    %31 = arith.addf %27, %30 : vector<7x1xf32>
    %32 = math.rsqrt %31 : vector<7x1xf32>
    %33 = vector.broadcast %32 : vector<7x1xf32> to vector<7x32xf32>
    %34 = arith.mulf %29, %33 : vector<7x32xf32>
    %c0_17 = arith.constant 0 : index
    %c0_18 = arith.constant 0 : index
    %35 = vector.load %arg7[%c0_17, %c0_18] : memref<1x32xf32, #tpu.memory_space<vmem>>, vector<1x32xf32>
    %36 = vector.broadcast %35 : vector<1x32xf32> to vector<7x32xf32>
    %37 = arith.mulf %34, %36 : vector<7x32xf32>
    %c0_19 = arith.constant 0 : index
    %c0_20 = arith.constant 0 : index
    %38 = vector.load %arg8[%c0_19, %c0_20] : memref<1x32xf32, #tpu.memory_space<vmem>>, vector<1x32xf32>
    %39 = vector.broadcast %38 : vector<1x32xf32> to vector<7x32xf32>
    %40 = arith.addf %37, %39 : vector<7x32xf32>
    %c0_21 = arith.constant 0 : index
    %c0_22 = arith.constant 0 : index
    %c0_23 = arith.constant 0 : index
    %41 = vector.load %arg2[%c0_21, %c0_22, %c0_23] : memref<1x7x1xf32, #tpu.memory_space<vmem>>, vector<1x7x1xf32>
    %42 = vector.shape_cast %41 : vector<1x7x1xf32> to vector<7x1xf32>
    %43 = vector.broadcast %42 : vector<7x1xf32> to vector<7x32xf32>
    %44 = arith.mulf %40, %43 : vector<7x32xf32>
    %45 = arith.truncf %44 : vector<7x32xf32> to vector<7x32xbf16>
    %c0_24 = arith.constant 0 : index
    %c0_25 = arith.constant 0 : index
    %c0_26 = arith.constant 0 : index
    %46 = vector.load %arg9[%c0_24, %c0_25, %c0_26] : memref<1x7x32xbf16, #tpu.memory_space<vmem>>, vector<1x7x32xbf16>
    %47 = vector.shape_cast %46 : vector<1x7x32xbf16> to vector<7x32xbf16>
    %48 = vector.shape_cast %45 : vector<7x32xbf16> to vector<1x7x32xbf16>
    tpu.vector_store %arg9[%c0_24, %c0_25, %c0_26], %48 {strides = array<i32>} : memref<1x7x32xbf16, #tpu.memory_space<vmem>>, vector<1x7x32xbf16>,
    return
  }
  func.func @transform_0(%arg0: i32) -> (i32, i32, i32) {
    %c0_i32 = arith.constant 0 : i32
    %c0_i32_0 = arith.constant 0 : i32
    %c0_i32_1 = arith.constant 0 : i32
    return %arg0, %c0_i32, %c0_i32_0 : i32, i32, i32
  }
  func.func @transform_1(%arg0: i32) -> (i32, i32, i32) {
    %c0_i32 = arith.constant 0 : i32
    %c0_i32_0 = arith.constant 0 : i32
    %c0_i32_1 = arith.constant 0 : i32
    return %arg0, %c0_i32, %c0_i32_0 : i32, i32, i32
  }
  func.func @transform_2(%arg0: i32) -> (i32, i32) {
    %c0_i32 = arith.constant 0 : i32
    %c0_i32_0 = arith.constant 0 : i32
    %c0_i32_1 = arith.constant 0 : i32
    return %c0_i32, %c0_i32_0 : i32, i32
  }
  func.func @transform_3(%arg0: i32) -> (i32, i32) {
    %c0_i32 = arith.constant 0 : i32
    %c0_i32_0 = arith.constant 0 : i32
    %c0_i32_1 = arith.constant 0 : i32
    return %c0_i32, %c0_i32_0 : i32, i32
  }
  func.func @transform_4(%arg0: i32) -> (i32, i32) {
    %c0_i32 = arith.constant 0 : i32
    %c0_i32_0 = arith.constant 0 : i32
    %c0_i32_1 = arith.constant 0 : i32
    return %c0_i32, %c0_i32_0 : i32, i32
  }
  func.func @transform_5(%arg0: i32) -> (i32, i32) {
    %c0_i32 = arith.constant 0 : i32
    %c0_i32_0 = arith.constant 0 : i32
    %c0_i32_1 = arith.constant 0 : i32
    return %c0_i32, %c0_i32_0 : i32, i32
  }
  func.func @transform_6(%arg0: i32) -> (i32, i32) {
    %c0_i32 = arith.constant 0 : i32
    %c0_i32_0 = arith.constant 0 : i32
    %c0_i32_1 = arith.constant 0 : i32
    return %c0_i32, %c0_i32_0 : i32, i32
  }
  func.func @transform_7(%arg0: i32) -> (i32, i32) {
    %c0_i32 = arith.constant 0 : i32
    %c0_i32_0 = arith.constant 0 : i32
    %c0_i32_1 = arith.constant 0 : i32
    return %c0_i32, %c0_i32_0 : i32, i32
  }
  func.func @transform_8(%arg0: i32) -> (i32, i32, i32) {
    %c0_i32 = arith.constant 0 : i32
    %c0_i32_0 = arith.constant 0 : i32
    %c0_i32_1 = arith.constant 0 : i32
    return %arg0, %c0_i32, %c0_i32_0 : i32, i32, i32
  }
}

module attributes {stable_mosaic.version = 11 : i64} {
  func.func @_proj_kernel(%arg0: i32, %arg1: i32, %arg2: memref<14x32xbf16, #tpu.memory_space<vmem>>, %arg3: memref<32x32xbf16, #tpu.memory_space<vmem>>, %arg4: memref<14x32xf32, #tpu.memory_space<vmem>>) attributes {dimension_semantics = [#tpu.dimension_semantics<parallel>, #tpu.dimension_semantics<parallel>], iteration_bounds = array<i64: 1, 1>, scalar_prefetch = 0 : i64, scratch_operands = 0 : i64, tpu.core_type = #tpu.core_type<tc>, window_params = [{transform_indices = @transform_0, window_bounds = array<i64: 14, 32>}, {transform_indices = @transform_1, window_bounds = array<i64: 32, 32>}, {transform_indices = @transform_2, window_bounds = array<i64: 14, 32>}]} {
    %c0 = arith.constant 0 : index
    %c0_0 = arith.constant 0 : index
    %0 = vector.load %arg2[%c0, %c0_0] : memref<14x32xbf16, #tpu.memory_space<vmem>>, vector<14x32xbf16>
    %c0_1 = arith.constant 0 : index
    %c0_2 = arith.constant 0 : index
    %1 = vector.load %arg3[%c0_1, %c0_2] : memref<32x32xbf16, #tpu.memory_space<vmem>>, vector<32x32xbf16>
    %cst = arith.constant dense<0.000000e+00> : vector<14x32xf32>
    %2 = tpu.matmul %0, %1, %cst {dimension_numbers = #tpu.dot_dimension_numbers<[1], [0], [0], [1], [0, 0, 1, 1], [], []>} : vector<14x32xbf16>, vector<32x32xbf16>, vector<14x32xf32> -> vector<14x32xf32>
    %c0_3 = arith.constant 0 : index
    %c0_4 = arith.constant 0 : index
    %3 = vector.load %arg4[%c0_3, %c0_4] : memref<14x32xf32, #tpu.memory_space<vmem>>, vector<14x32xf32>
    tpu.vector_store %arg4[%c0_3, %c0_4], %2 {strides = array<i32>} : memref<14x32xf32, #tpu.memory_space<vmem>>, vector<14x32xf32>,
    return
  }
  func.func @transform_0(%arg0: i32, %arg1: i32) -> (i32, i32) {
    %c0_i32 = arith.constant 0 : i32
    %c0_i32_0 = arith.constant 0 : i32
    return %arg0, %c0_i32 : i32, i32
  }
  func.func @transform_1(%arg0: i32, %arg1: i32) -> (i32, i32) {
    %c0_i32 = arith.constant 0 : i32
    %c0_i32_0 = arith.constant 0 : i32
    return %c0_i32, %arg1 : i32, i32
  }
  func.func @transform_2(%arg0: i32, %arg1: i32) -> (i32, i32) {
    %c0_i32 = arith.constant 0 : i32
    return %arg0, %arg1 : i32, i32
  }
}

</mosaic_0001>

<bundles_post_ra>
// kernel: _lambda_.12
= control target key start
LH: loop header
LB: loop body
LE: loop exit
PB: predicated region body
PF: predicated region fallthrough
CT: control target
= control target key end

     0   :  { %s706_s27 = smov 0   ;;  %s767_s0 = inlined_call_operand.vmem [shape: bf16[2,8,32], index: 0, kind: input, shape index: {}]   ;;  %s768_s1 = inlined_call_operand.vmem [shape: f32[2,8,1], index: 1, kind: input, shape index: {}]   ;;  %s769_s2 = inlined_call_operand.vmem [shape: bf16[32,64], index: 2, kind: input, shape index: {}]   ;;  %s770_s3 = inlined_call_operand.vmem [shape: f32[1,64], index: 3, kind: input, shape index: {}]   ;;  %s771_s4 = inlined_call_operand.vmem [shape: bf16[64,32], index: 4, kind: input, shape index: {}]   ;;  %s772_s5 = inlined_call_operand.vmem [shape: f32[1,32], index: 5, kind: input, shape index: {}]   ;;  %s773_s6 = inlined_call_operand.vmem [shape: f32[1,32], index: 6, kind: input, shape index: {}]   ;;  %s774_s7 = inlined_call_operand.vmem [shape: f32[1,32], index: 7, kind: input, shape index: {}]   ;;  %s775_s8 = inlined_call_operand.vmem [shape: bf16[2,8,32], index: 8, kind: output, shape index: {}]  }
   0x1 LB: > { %s579_s28 = sadd.s32 4294967295, %s656_s27   ;;  %p583_p0 = scmp.ge.s32.totalorder %s656_s27, 1  ;;  %s656_s27 = sphi %s706_s27, %s18_s27  }
   0x2   : > { %p270_p1 = scmp.lt.s32.totalorder %s656_s27, 3 }
   0x4   : > { %p271_p2 = pnand %p583_p0, %p270_p1 }
   0x5   : > { %p306_p3 = scmp.lt.s32.totalorder (!%p271_p2), %s579_s28, 1 }
   0x6   : > { %274 = sbr.rel (%p271_p2) target bundleno = 729 (0x2d9), region = 52 }
   0xb   : > { %v642_v0 = vld [vmem:[%s769_s2 + $0x8] sm:$0xff]   ;;  %v658_v1 = vmov 0.0   ;;  %v643_v2 = vld [vmem:[%s769_s2] sm:$0xff]   ;;  %vm659_vm0 = vmmov 0   ;;  %v644_v3 = vld [vmem:[%s771_s4 + $0x18] sm:$0xff]   ;;  %s777_s28 = smov (!%p306_p3, %s579_s28), 1 }
   0xc   : > { %609 = vmatprep.subr.bf16.mxu0 %v658_v1  ;;  %617 = vmatprep.subr.bf16.mxu1 %v658_v1  ;;  %v645_v4 = vld [vmem:[%s771_s4 + $0x10] sm:$0xff]   ;;  %s584_s15 = sshll.u32 %s777_s28, 2  ;;  %vm343_vm1 = vcmask 261120   ;;  %v646_v6 = vld [vmem:[%s771_s4 + $0x8] sm:$0xff]   ;;  %v647_v7 = vld [vmem:[%s771_s4] sm:$0xff]   ;;  %vm428_vm2 = vcmask 523264  }
   0xd   : > { %610 = vmatpush3.bf16.msra.mxu0 %v642_v0  ;;  %613 = vmatprep.mubr.msk.bf16.mxu0 %vm659_vm0, %v658_v1  ;;  %s309_s18 = scalar_lea.vmem %s767_s0, %s584_s15  ;;  %v587_v8 = vld [vmem:[%s770_s3] ss:$0 sm:$0xff]  ;;  %s585_s29 = sshll.u32 %s777_s28, 3  ;;  %v660_v25 = vmov 0   ;;  %vm512_vm3 = vcmask 257024  }
   0xe   : > { %611 = vmatprep.subr.bf16.mxu0 %v658_v1  ;;  %625 = vmatprep.mubr.msk.bf16.mxu1 %vm659_vm0, %v658_v1  ;;  %v319_v5 = vld [vmem:[%s309_s18] sm:$0xf]  ;;  %s313_s10 = scalar_lea.vmem %s768_s1, %s585_s29  ;;  %s317_s18 = scalar_lea.vmem %s775_s8, %s584_s15 }
   0xf   : > { %618 = vmatpush3.bf16.msra.mxu1 %v644_v3  ;;  %v591_v16 = vld [vmem:[%s772_s5] ss:$0 sm:$0xff]  ;;  %v472_v17 = vunpack.c.l.bf16 %v319_v5  ;;  %640 = vset.pattern.permute.xlu1 %v660_v25 }
  0x10   : > { %619 = vmatprep.subr.bf16.mxu1 %v658_v1  ;;  %641 = vset.pattern.permute.xlu0 %v660_v25  ;;  %v504_v26 = vld [vmem:[%s313_s10] sm:$0xff] }
  0x11   : > { %612 = vmatpush3.bf16.msra.mxu0 %v643_v2  ;;  %507 = vperm.xlu1 %640, %v504_v26   ;;  %v597_v36 = vld [vmem:[%s773_s6] ss:$0 sm:$0xff] }
  0x12   : > { %v598_v38 = vld [vmem:[%s774_s7] ss:$0 sm:$0xff] }
  0x13   : > { %620 = vmatpush3.bf16.msra.mxu1 %v645_v4 }
  0x14   : > { %614 = vmatmul.mubr.msk.bf16.vlgmr.msra.gmra.mxu0 %vm343_vm1, %v319_v5  ;;  %621 = vmatprep.subr.bf16.mxu1 %v658_v1 }
  0x17   : > { %622 = vmatpush3.bf16.msra.mxu1 %v646_v6 }
  0x18   : > { %623 = vmatprep.subr.bf16.mxu1 %v658_v1 }
  0x1b   : > { %624 = vmatpush3.bf16.msra.mxu1 %v647_v7 }
  0x8c   : > { %v508_v40 = vpop.permute.xlu1 %507 }
  0xd4   : > { %v381_v9 = vpop.f32.mrf.mxu0 }
  0xd5   : > { %v382_v10 = vadd.f32 %v587_v8, %v381_v9 }
  0xd6   : > { %v615_v11 = vpop.f32.mrf.mxu0 }
  0xd7   : > { %v387_v12 = vmax.f32 %v382_v10, 0.0 }
  0xd8   : > { %v384_v13 = vpop.f32.mrf.mxu0 }
  0xd9   : > { %v388_v14 = vpack.c.bf16 %v387_v12, %v387_v12 }
  0xda   : > { %v616_v15 = vpop.f32.mrf.mxu0 }
  0xdb   : > { %626 = vmatmul.mubr.msk.bf16.vlgmr.msra.gmra.mxu1 %vm428_vm2, %v388_v14 }
 0x19b   : > { %v466_v18 = vpop.f32.mrf.mxu1 }
 0x19c   : > { %v467_v19 = vadd.f32 %v591_v16, %v466_v18 }
 0x19d   : > { %v627_v20 = vpop.f32.mrf.mxu1 }
 0x19e   : > { %v473_v21 = vadd.f32 %v472_v17, %v467_v19 }
 0x19f   : > { %v469_v22 = vpop.f32.mrf.mxu1 }
 0x1a0   : > { %v474_v23 = vsel %vm343_vm1, %v473_v21, 0.0 }
 0x1a1   : > { %475 = vadd.xlane.f32.xlu0 %v474_v23  ;;  %v628_v24 = vpop.f32.mrf.mxu1 }
 0x22a   : > { %v476_v27 = vpop.xlane.xlu0 %475 }
 0x22b   : > { %v478_v28 = vmul.f32 0.03125, %v476_v27 }
 0x22d   : > { %v479_v29 = vsub.f32 %v473_v21, %v478_v28 }
 0x22f   : > { %v480_v30 = vmul.f32 %v479_v29, %v479_v29 }
 0x231   : > { %v481_v31 = vsel %vm343_vm1, %v480_v30, 0.0 }
 0x232   : > { %482 = vadd.xlane.f32.xlu0 %v481_v31 }
 0x2bb   : > { %v483_v32 = vpop.xlane.xlu0 %482 }
 0x2bc   : > { %v484_v33 = vmul.f32 0.03125, %v483_v32 }
 0x2be   : > { %v485_v34 = vadd.f32 1e-05, %v484_v33 }
 0x2c0   : > { %648 = vrsqrt.f32 %v485_v34 }
 0x2cd   : > { %v649_v35 = vpop.eup %648 }
 0x2ce   : > { %v487_v37 = vmul.f32 %v649_v35, %v479_v29 }
 0x2d0   : > { %v495_v39 = vmul.f32 %v597_v36, %v487_v37 }
 0x2d2   : > { %v503_v41 = vadd.f32 %v598_v38, %v495_v39 }
 0x2d4   : > { %v510_v42 = vmul.f32 %v508_v40, %v503_v41 }
 0x2d6   : > { %v511_v43 = vpack.c.bf16 %v510_v42, %v510_v42 }
 0x2d8   : > { %513 = vst.msk [vmem:[%s317_s18] sm:$0xf] %vm512_vm3, %v511_v43 }
 0x2d9 PF: > { %s18_s27 = sadd.s32 1, %s656_s27  }
 0x2da   : > { %p15_p4 = scmp.ge.s32.totalorder %s18_s27, 4  }
 0x2dc   :  { %17 = sbr.rel (!%p15_p4) target bundleno = 1 (0x1), region = 85 }

// kernel: _lambda_.11
= control target key start
LH: loop header
LB: loop body
LE: loop exit
PB: predicated region body
PF: predicated region fallthrough
CT: control target
= control target key end

     0   :  { %s1276_s21 = smov 0   ;;  %s1399_s0 = inlined_call_operand.vmem [shape: bf16[2,8,32], index: 0, kind: input, shape index: {}, may-alias: {0,1}]   ;;  %s1400_s1 = inlined_call_operand.vmem [shape: bf16[2,8,32], index: 1, kind: input, shape index: {}, may-alias: {0,1}]   ;;  %s1401_s2 = inlined_call_operand.vmem [shape: s32[2,1,8], index: 2, kind: input, shape index: {}]   ;;  %s1402_s3 = inlined_call_operand.vmem [shape: f32[2,8,1], index: 3, kind: input, shape index: {}]   ;;  %s1403_s4 = inlined_call_operand.vmem [shape: bf16[32,32], index: 4, kind: input, shape index: {}]   ;;  %s1404_s5 = inlined_call_operand.vmem [shape: f32[1,32], index: 5, kind: input, shape index: {}]   ;;  %s1405_s6 = inlined_call_operand.vmem [shape: bf16[32,64], index: 6, kind: input, shape index: {}]   ;;  %s1406_s7 = inlined_call_operand.vmem [shape: f32[1,64], index: 7, kind: input, shape index: {}]   ;;  %s1407_s8 = inlined_call_operand.vmem [shape: bf16[32,32], index: 8, kind: input, shape index: {}]   ;;  %s1408_s9 = inlined_call_operand.vmem [shape: f32[1,32], index: 9, kind: input, shape index: {}]   ;;  %s1409_s10 = inlined_call_operand.vmem [shape: f32[1,32], index: 10, kind: input, shape index: {}]   ;;  %s1410_s11 = inlined_call_operand.vmem [shape: f32[1,32], index: 11, kind: input, shape index: {}]   ;;  %s1411_s12 = inlined_call_operand.vmem [shape: bf16[2,8,32], index: 12, kind: output, shape index: {}]  }
   0x1 LB: > { %s1066_s22 = sadd.s32 4294967295, %s1203_s21   ;;  %p1070_p0 = scmp.ge.s32.totalorder %s1203_s21, 1  ;;  %s1203_s21 = sphi %s1276_s21, %s22_s21  }
   0x2   : > { %p387_p1 = scmp.lt.s32.totalorder %s1203_s21, 3 }
   0x4   : > { %p388_p2 = pnand %p1070_p0, %p387_p1 }
   0x5   : > { %p438_p3 = scmp.lt.s32.totalorder (!%p388_p2), %s1066_s22, 1  ;;  %s1208_s26 = smov (!%p388_p2), 112  }
   0x6   : > { %391 = sbr.rel (%p388_p2) target bundleno = 1555 (0x613), region = 68  ;;  %s1209_s30 = smov (!%p388_p2), 96  }
   0x7   : > { %s1210_s14 = smov (!%p388_p2), 80  }
   0xb   : > { %v1181_v0 = vld [vmem:[%s1405_s6 + $0x8] sm:$0xff]   ;;  %v1205_v1 = vmov 0.0   ;;  %v1183_v3 = vld [vmem:[%s1405_s6] sm:$0xff]   ;;  %vm1206_vm0 = vmmov 0   ;;  %s1413_s22 = smov (!%p438_p3, %s1066_s22), 1  ;;  %vm483_vm1 = vcmask 261120   ;;  %v596_v26 = vlaneseq }
   0xc   : > { %1122 = vmatprep.subr.bf16.mxu1 %v1205_v1  ;;  %1114 = vmatprep.subr.bf16.mxu0 %v1205_v1  ;;  %v1182_v2 = vld [vmem:[%s1403_s4 + $0x8] sm:$0xff]   ;;  %v1184_v4 = vld [vmem:[%s1403_s4] sm:$0xff]   ;;  %s1307_s13 = sshll.u32 %s1413_s22, 2  ;;  %v1207_v12 = vmov 0   ;;  %vm603_vm2 = vcmask 130048   ;;  %s448_s29 = scalar_lea.vmem %s1401_s2, %s1413_s22  ;;  %vm651_vm5 = vcmask 64512  }
   0xd   : > { %1123 = vmatpush3.bf16.msra.mxu1 %v1181_v0  ;;  %1126 = vmatprep.mubr.msk.bf16.mxu1 %vm1206_vm0, %v1205_v1  ;;  %s445_s16 = scalar_lea.vmem %s1400_s1, %s1307_s13  ;;  %s441_s19 = scalar_lea.vmem %s1399_s0, %s1307_s13  ;;  %v1079_v7 = vld [vmem:[%s1406_s7] ss:$0 sm:$0xff]  ;;  %v597_v28 = vshrl.u32 %v596_v26, 7  ;;  %vm670_vm6 = vcmask 1043456   ;;  %v1186_v60 = vld [vmem:[%s1407_s8 + $0x8] sm:$0xff]   ;;  %vm978_vm7 = vcmask 257024  }
   0xe   : > { %1115 = vmatpush3.bf16.msra.mxu0 %v1182_v2  ;;  %1124 = vmatprep.subr.bf16.mxu1 %v1205_v1  ;;  %v459_v5 = vld [vmem:[%s445_s16] sm:$0xf]  ;;  %s1073_s23 = sshll.u32 %s1413_s22, 3  ;;  %s456_s15 = scalar_lea.vmem %s1411_s12, %s1307_s13 }
   0xf   : > { %1116 = vmatprep.subr.bf16.mxu0 %v1205_v1  ;;  %1118 = vmatprep.mubr.msk.bf16.mxu0 %vm1206_vm0, %v1205_v1  ;;  %v1318_v6 = vld [vmem:[%s441_s19] sm:$0xf]  ;;  %v598_v29 = vsub.s32 0, %v597_v28 }
  0x10   : > { %v1075_v8 = vld [vmem:[%s1404_s5] ss:$0 sm:$0xff]  ;;  %1180 = vset.pattern.permute.xlu0 %v1207_v12 }
  0x11   : > { %1125 = vmatpush3.bf16.msra.mxu1 %v1183_v3  ;;  %v593_v27 = vld [vmem:[%s448_s29] sm:$0x1] }
  0x12   : > { %1117 = vmatpush3.bf16.msra.mxu0 %v1184_v4  ;;  %1136 = vmatprep.subr.bf16.mxu1 %v1205_v1  ;;  %vm594_vm3 = vcmp.ne.s32.totalorder %v593_v27, 0  ;;  %v1185_v3 = vld [vmem:[%s1407_s8] sm:$0xff]  }
  0x13   : > { %1130 = vmatprep.subr.bf16.mxu0 %v1205_v1  ;;  %v595_v30 = vsel %vm594_vm3, 1, %v1207_v12 }
  0x14   : > { %1127 = vmatmul.mubr.msk.bf16.vlgmr.msra.gmra.mxu1 %vm483_vm1, %v459_v5  ;;  %v599_v31 = vrot.slane %v595_v30, %v598_v29 }
  0x15   : > { %1119 = vmatmul.mubr.msk.bf16.vlgmr.msra.gmra.mxu0 %vm483_vm1, %v1318_v6  ;;  %1138 = vmatprep.mubr.msk.bf16.mxu1 %vm1206_vm0, %v1205_v1 }
  0x16   : > { %1132 = vmatprep.mubr.msk.bf16.mxu0 %vm1206_vm0, %v1205_v1  ;;  %vm600_vm4 = vcmp.eq.s32.totalorder %v599_v31, 1 }
  0xd4   : > { %v587_v9 = vpop.f32.mrf.mxu1 }
  0xd5   : > { %v588_v10 = vadd.f32 %v1079_v7, %v587_v9  ;;  %v521_v11 = vpop.f32.mrf.mxu0 }
  0xd6   : > { %v1128_v13 = vpop.f32.mrf.mxu1  ;;  %v522_v14 = vadd.f32 %v1075_v8, %v521_v11 }
  0xd7   : > { %v1334_v15 = vpack.c.bf16 %v588_v10, %v588_v10  ;;  %v1120_v16 = vpop.f32.mrf.mxu0 }
  0xd8   : > { %v590_v17 = vpop.f32.mrf.mxu1  ;;  %v601_v18 = vpack.c.bf16 %v522_v14, %v522_v14 }
  0xd9   : > { %720 = vrot.lane.b32.xlu0 %v1334_v15, %s1208_s26  ;;  %v608_v19 = vsel %vm603_vm2, %v1334_v15, 0  ;;  %v524_v20 = vpop.f32.mrf.mxu0 }
  0xda   : > { %v1129_v21 = vpop.f32.mrf.mxu1  ;;  %1131 = vmatpush3.bf16.xpose.msra.mxu0 %v608_v19 }
  0xdb   : > { %v1121_v22 = vpop.f32.mrf.mxu0  ;;  %1142 = vmatprep.subr.bf16.mxu0 %v1205_v1 }
  0xdc   : > { %v938_v22 = vunpack.c.l.bf16 %v1318_v6 }
  0xdd   : > { %718 = vrot.lane.b32.xlu0 %v601_v18, %s1208_s26  ;;  %s452_s26 = scalar_lea.vmem %s1402_s3, %s1073_s23 }
  0xde   : > { %v970_v6 = vld [vmem:[%s452_s26] sm:$0xff] }
  0xe1   : > { %1133 = vmatmul.mubr.msk.bf16.vlgmr.msra.gmra.mxu0 %vm603_vm2, %v601_v18 }
  0xe2   : > { %1144 = vmatprep.mubr.msk.bf16.mxu0 %vm1206_vm0, %v1205_v1 }
 0x14b   : > { %v721_v23 = vpop.permute.xlu0 %720 }
 0x14c   : > { %v726_v24 = vsel %vm603_vm2, %v721_v23, 0 }
 0x14d   : > { %1143 = vmatpush3.bf16.xpose.msra.mxu0 %v726_v24 }
 0x14e   : > { %1154 = vmatprep.subr.bf16.mxu0 %v1205_v1 }
 0x14f   : > { %v719_v25 = vpop.permute.xlu0 %718 }
 0x154   : > { %1145 = vmatmul.mubr.msk.bf16.vlgmr.msra.gmra.mxu0 %vm603_vm2, %v719_v25 }
 0x155   : > { %1156 = vmatprep.mubr.msk.bf16.mxu0 %vm1206_vm0, %v1205_v1  ;;  %1155 = vmatpush3.bf16.msra.mxu0 %v1186_v60 }
 0x1a1   : > { %v644_v32 = vpop.f32.mrf.mxu0 }
 0x1a2   : > { %v650_v33 = vsel %vm600_vm4, -1e+30, %v644_v32 }
 0x1a3   : > { %v1134_v34 = vpop.f32.mrf.mxu0  ;;  %v652_v35 = vsel %vm651_vm5, %v650_v33, -inf }
 0x1a4   : > { %653 = vmax.xlane.f32.xlu1 %v652_v35 }
 0x1a5   : > { %v647_v36 = vpop.f32.mrf.mxu0 }
 0x1a7   : > { %v1135_v37 = vpop.f32.mrf.mxu0 }
 0x214   : > { %v762_v38 = vpop.f32.mrf.mxu0 }
 0x215   : > { %v768_v39 = vsel %vm600_vm4, -1e+30, %v762_v38  ;;  %v1092_v38 = vld [vmem:[%s1409_s10] ss:$0 sm:$0xff] }
 0x216   : > { %v1146_v40 = vpop.f32.mrf.mxu0  ;;  %v769_v41 = vsel %vm651_vm5, %v768_v39, -inf }
 0x217   : > { %770 = vmax.xlane.f32.xlu1 %v769_v41  ;;  %v1093_v40 = vld [vmem:[%s1410_s11] ss:$0 sm:$0xff] }
 0x218   : > { %v765_v42 = vpop.f32.mrf.mxu0 }
 0x21a   : > { %v1147_v43 = vpop.f32.mrf.mxu0 }
 0x228   : > { %665 = vrot.lane.b32.xlu1 %v1334_v15, %s1209_s30 }
 0x22d   : > { %v654_v44 = vpop.xlane.xlu1 %653 }
 0x22e   : > { %v655_v45 = vsub.f32 %v650_v33, %v654_v44 }
 0x230   : > { %v656_v46 = vmul.f32 1.442695, %v655_v45 }
 0x232   : > { %1187 = vpow2.f32 %v656_v46 }
 0x23f   : > { %v1188_v47 = vpop.eup %1187 }
 0x240   : > { %v658_v48 = vsel %vm651_vm5, %v1188_v47, 0.0 }
 0x241   : > { %659 = vadd.xlane.f32.xlu0 %v658_v48 }
 0x2a0   : > { %v771_v49 = vpop.xlane.xlu1 %770 }
 0x2a1   : > { %v772_v50 = vsub.f32 %v768_v39, %v771_v49 }
 0x2a3   : > { %v773_v51 = vmul.f32 1.442695, %v772_v50 }
 0x2a4   : > { %v666_v52 = vpop.permute.xlu1 %665 }
 0x2a5   : > { %1189 = vpow2.f32 %v773_v51  ;;  %v672_v53 = vsel %vm670_vm6, %v666_v52, 0 }
 0x2a6   : > { %1137 = vmatpush3.bf16.msra.mxu1 %v672_v53 }
 0x2a7   : > { %1148 = vmatprep.subr.bf16.mxu1 %v1205_v1 }
 0x2b2   : > { %v1190_v54 = vpop.eup %1189 }
 0x2b3   : > { %v775_v55 = vsel %vm651_vm5, %v1190_v54, 0.0 }
 0x2b4   : > { %776 = vadd.xlane.f32.xlu1 %v775_v55 }
 0x2c5   : > { %781 = vrot.lane.b32.xlu1 %v1334_v15, %s1210_s14 }
 0x2ca   : > { %v660_v56 = vpop.xlane.xlu0 %659 }
 0x2cb   : > { %1191 = vrcp.f32 %v660_v56 }
 0x2d8   : > { %v1192_v57 = vpop.eup %1191 }
 0x2d9   : > { %v662_v58 = vmul.f32 %v1192_v57, %v1188_v47 }
 0x2db   : > { %v663_v59 = vpack.c.bf16 %v662_v58, %v662_v58 }
 0x2dd   : > { %1139 = vmatmul.mubr.msk.bf16.vlgmr.msra.gmra.mxu1 %vm651_vm5, %v663_v59 }
 0x2de   : > { %1150 = vmatprep.mubr.msk.bf16.mxu1 %vm1206_vm0, %v1205_v1 }
 0x33d   : > { %v777_v61 = vpop.xlane.xlu1 %776 }
 0x33e   : > { %1193 = vrcp.f32 %v777_v61 }
 0x341   : > { %v782_v62 = vpop.permute.xlu1 %781 }
 0x342   : > { %v787_v63 = vsel %vm670_vm6, %v782_v62, 0 }
 0x343   : > { %1149 = vmatpush3.bf16.msra.mxu1 %v787_v63 }
 0x344   : > { %1160 = vmatprep.subr.bf16.mxu1 %v1205_v1 }
 0x34b   : > { %v1194_v0 = vpop.eup %1193 }
 0x34c   : > { %v779_v2 = vmul.f32 %v1194_v0, %v1190_v54 }
 0x34e   : > { %v780_v4 = vpack.c.bf16 %v779_v2, %v779_v2 }
 0x350   : > { %1151 = vmatmul.mubr.msk.bf16.vlgmr.msra.gmra.mxu1 %vm651_vm5, %v780_v4 }
 0x351   : > { %1161 = vmatpush3.bf16.msra.mxu1 %v1185_v3  ;;  %1162 = vmatprep.mubr.msk.bf16.mxu1 %vm1206_vm0, %v1205_v1  ;;  %v1091_v1 = vld [vmem:[%s1408_s9] ss:$0 sm:$0xff] }
 0x39d   : > { %v708_v5 = vpop.f32.mrf.mxu1 }
 0x39e   : > { %v714_v7 = vpack.c.bf16 %v708_v5, %v708_v5 }
 0x39f   : > { %v1140_v8 = vpop.f32.mrf.mxu1 }
 0x3a0   : > { %1163 = vmatmul.mubr.msk.bf16.vlgmr.msra.gmra.mxu1 %vm603_vm2, %v714_v7 }
 0x3a1   : > { %v711_v9 = vpop.f32.mrf.mxu1 }
 0x3a3   : > { %v1141_v10 = vpop.f32.mrf.mxu1 }
 0x410   : > { %v823_v11 = vpop.f32.mrf.mxu1 }
 0x411   : > { %v829_v12 = vpack.c.bf16 %v823_v11, %v823_v11 }
 0x412   : > { %v1152_v13 = vpop.f32.mrf.mxu1 }
 0x413   : > { %1157 = vmatmul.mubr.msk.bf16.vlgmr.msra.gmra.mxu0 %vm603_vm2, %v829_v12 }
 0x414   : > { %v826_v14 = vpop.f32.mrf.mxu1 }
 0x416   : > { %v1153_v15 = vpop.f32.mrf.mxu1 }
 0x460   : > { %v924_v16 = vpop.f32.mrf.mxu1 }
 0x462   : > { %v1164_v17 = vpop.f32.mrf.mxu1 }
 0x464   : > { %v927_v18 = vpop.f32.mrf.mxu1 }
 0x466   : > { %v1165_v19 = vpop.f32.mrf.mxu1 }
 0x4d3   : > { %v875_v20 = vpop.f32.mrf.mxu0 }
 0x4d4   : > { %v925_v21 = vadd.f32 %v924_v16, %v875_v20 }
 0x4d5   : > { %v1158_v23 = vpop.f32.mrf.mxu0 }
 0x4d6   : > { %v937_v24 = vadd.f32 %v1091_v1, %v925_v21 }
 0x4d7   : > { %v878_v25 = vpop.f32.mrf.mxu0 }
 0x4d8   : > { %v939_v26 = vadd.f32 %v938_v22, %v937_v24 }
 0x4d9   : > { %v1159_v27 = vpop.f32.mrf.mxu0 }
 0x4da   : > { %v940_v28 = vsel %vm483_vm1, %v939_v26, 0.0 }
 0x4db   : > { %941 = vadd.xlane.f32.xlu1 %v940_v28 }
 0x564   : > { %v942_v29 = vpop.xlane.xlu1 %941 }
 0x565   : > { %v944_v30 = vmul.f32 0.03125, %v942_v29 }
 0x567   : > { %v945_v31 = vsub.f32 %v939_v26, %v944_v30 }
 0x569   : > { %v946_v32 = vmul.f32 %v945_v31, %v945_v31 }
 0x56b   : > { %v947_v33 = vsel %vm483_vm1, %v946_v32, 0.0 }
 0x56c   : > { %948 = vadd.xlane.f32.xlu0 %v947_v33 }
 0x582   : > { %973 = vperm.xlu0 %1180, %v970_v6  }
 0x5f5   : > { %v949_v34 = vpop.xlane.xlu0 %948 }
 0x5f6   : > { %v950_v35 = vmul.f32 0.03125, %v949_v34 }
 0x5f8   : > { %v951_v36 = vadd.f32 1e-05, %v950_v35 }
 0x5fa   : > { %1195 = vrsqrt.f32 %v951_v36 }
 0x5fd   : > { %v974_v42 = vpop.permute.xlu0 %973 }
 0x607   : > { %v1196_v37 = vpop.eup %1195 }
 0x608   : > { %v953_v39 = vmul.f32 %v1196_v37, %v945_v31 }
 0x60a   : > { %v961_v41 = vmul.f32 %v1092_v38, %v953_v39 }
 0x60c   : > { %v969_v43 = vadd.f32 %v1093_v40, %v961_v41 }
 0x60e   : > { %v976_v44 = vmul.f32 %v974_v42, %v969_v43 }
 0x610   : > { %v977_v45 = vpack.c.bf16 %v976_v44, %v976_v44 }
 0x612   : > { %979 = vst.msk [vmem:[%s456_s15] sm:$0xf] %vm978_vm7, %v977_v45 }
 0x613 PF: > { %s22_s21 = sadd.s32 1, %s1203_s21  }
 0x614   : > { %p19_p4 = scmp.ge.s32.totalorder %s22_s21, 4  }
 0x616   :  { %21 = sbr.rel (!%p19_p4) target bundleno = 1 (0x1), region = 107 }

// kernel: _lambda_.15
= control target key start
LH: loop header
LB: loop body
LE: loop exit
PB: predicated region body
PF: predicated region fallthrough
CT: control target
= control target key end

     0   :  { %s1293_s21 = smov 0   ;;  %s1410_s0 = inlined_call_operand.vmem [shape: bf16[2,7,32], index: 0, kind: input, shape index: {}, may-alias: {0,1}]   ;;  %s1411_s1 = inlined_call_operand.vmem [shape: bf16[2,7,32], index: 1, kind: input, shape index: {}, may-alias: {0,1}]   ;;  %s1412_s2 = inlined_call_operand.vmem [shape: s32[2,1,7], index: 2, kind: input, shape index: {}]   ;;  %s1413_s3 = inlined_call_operand.vmem [shape: f32[2,7,1], index: 3, kind: input, shape index: {}]   ;;  %s1414_s4 = inlined_call_operand.vmem [shape: bf16[32,32], index: 4, kind: input, shape index: {}]   ;;  %s1415_s5 = inlined_call_operand.vmem [shape: f32[1,32], index: 5, kind: input, shape index: {}]   ;;  %s1416_s6 = inlined_call_operand.vmem [shape: bf16[32,64], index: 6, kind: input, shape index: {}]   ;;  %s1417_s7 = inlined_call_operand.vmem [shape: f32[1,64], index: 7, kind: input, shape index: {}]   ;;  %s1418_s8 = inlined_call_operand.vmem [shape: bf16[32,32], index: 8, kind: input, shape index: {}]   ;;  %s1419_s9 = inlined_call_operand.vmem [shape: f32[1,32], index: 9, kind: input, shape index: {}]   ;;  %s1420_s10 = inlined_call_operand.vmem [shape: f32[1,32], index: 10, kind: input, shape index: {}]   ;;  %s1421_s11 = inlined_call_operand.vmem [shape: f32[1,32], index: 11, kind: input, shape index: {}]   ;;  %s1422_s12 = inlined_call_operand.vmem [shape: bf16[2,7,32], index: 12, kind: output, shape index: {}]  }
   0x1 LB: > { %s1081_s22 = sadd.s32 4294967295, %s1219_s21   ;;  %p1085_p0 = scmp.ge.s32.totalorder %s1219_s21, 1  ;;  %s1219_s21 = sphi %s1293_s21, %s22_s21  }
   0x2   : > { %p387_p1 = scmp.lt.s32.totalorder %s1219_s21, 3 }
   0x4   : > { %p388_p2 = pnand %p1085_p0, %p387_p1 }
   0x5   : > { %p438_p3 = scmp.lt.s32.totalorder (!%p388_p2), %s1081_s22, 1  ;;  %s1224_s26 = smov (!%p388_p2), 112  }
   0x6   : > { %391 = sbr.rel (%p388_p2) target bundleno = 1556 (0x614), region = 68  ;;  %s1225_s30 = smov (!%p388_p2), 96  }
   0x7   : > { %s1227_s14 = smov (!%p388_p2), 80  }
   0xb   : > { %v1197_v0 = vld [vmem:[%s1416_s6 + $0x8] sm:$0xff]   ;;  %v1221_v1 = vmov 0.0   ;;  %v1199_v3 = vld [vmem:[%s1416_s6] sm:$0xff]   ;;  %vm1222_vm0 = vmmov 0   ;;  %s1424_s22 = smov (!%p438_p3, %s1081_s22), 1  ;;  %vm483_vm1 = vcmask 261120   ;;  %v596_v26 = vlaneseq }
   0xc   : > { %1137 = vmatprep.subr.bf16.mxu1 %v1221_v1  ;;  %1129 = vmatprep.subr.bf16.mxu0 %v1221_v1  ;;  %v1198_v2 = vld [vmem:[%s1414_s4 + $0x8] sm:$0xff]   ;;  %v1200_v4 = vld [vmem:[%s1414_s4] sm:$0xff]   ;;  %s1324_s13 = sshll.u32 %s1424_s22, 2  ;;  %v1223_v12 = vmov 0   ;;  %vm609_vm2 = vcmask 130048   ;;  %s448_s29 = scalar_lea.vmem %s1412_s2, %s1424_s22  ;;  %vm657_vm7 = vcmask 55296  }
   0xd   : > { %1138 = vmatpush3.bf16.msra.mxu1 %v1197_v0  ;;  %1141 = vmatprep.mubr.msk.bf16.mxu1 %vm1222_vm0, %v1221_v1  ;;  %s445_s16 = scalar_lea.vmem %s1411_s1, %s1324_s13  ;;  %s441_s19 = scalar_lea.vmem %s1410_s0, %s1324_s13  ;;  %v1094_v7 = vld [vmem:[%s1417_s7] ss:$0 sm:$0xff]  ;;  %v597_v28 = vshrl.u32 %v596_v26, 7  ;;  %v604_v32 = vand.u32 127, %v596_v26  ;;  %vm677_vm8 = vcmask 1042432   ;;  %vm678_vm9 = vcmask 1043456  }
   0xe   : > { %1130 = vmatpush3.bf16.msra.mxu0 %v1198_v2  ;;  %1139 = vmatprep.subr.bf16.mxu1 %v1221_v1  ;;  %v459_v5 = vld [vmem:[%s445_s16] sm:$0xf]  ;;  %v1226_v50 = vmov 65535   ;;  %vm673_vm10 = vcmask 56320   ;;  %v1202_v0 = vld [vmem:[%s1418_s8 + $0x8] sm:$0xff]   ;;  %vm950_vm11 = vcmask 260096   ;;  %s456_s15 = scalar_lea.vmem %s1422_s12, %s1324_s13 }
   0xf   : > { %1131 = vmatprep.subr.bf16.mxu0 %v1221_v1  ;;  %1133 = vmatprep.mubr.msk.bf16.mxu0 %vm1222_vm0, %v1221_v1  ;;  %v1336_v6 = vld [vmem:[%s441_s19] sm:$0xf]  ;;  %v598_v29 = vsub.s32 0, %v597_v28  ;;  %vm605_vm5 = vcmp.gt.s32.totalorder %v604_v32, %v597_v28  ;;  %v679_v51 = vsel %vm677_vm8, 4294967295, %v1226_v50  ;;  %s1088_s23 = sshll.u32 %s1424_s22, 3  ;;  %vm989_vm12 = vcmask 257024  }
  0x10   : > { %v1090_v8 = vld [vmem:[%s1415_s5] ss:$0 sm:$0xff]  ;;  %1196 = vset.pattern.permute.xlu0 %v1223_v12  ;;  %v680_v54 = vsel %vm678_vm9, %v679_v51, 0  ;;  %v948_v26 = vunpack.c.l.bf16 %v1336_v6  ;;  %vm990_vm13 = vsmask.f32 3328 }
  0x11   : > { %1140 = vmatpush3.bf16.msra.mxu1 %v1199_v3  ;;  %v593_v27 = vld [vmem:[%s448_s29] sm:$0x1]  ;;  %vm991_vm14 = vmand %vm989_vm12, %vm990_vm13 }
  0x12   : > { %1132 = vmatpush3.bf16.msra.mxu0 %v1200_v4  ;;  %1151 = vmatprep.subr.bf16.mxu1 %v1221_v1  ;;  %vm594_vm3 = vcmp.ne.s32.totalorder %v593_v27, 0 }
  0x13   : > { %1145 = vmatprep.subr.bf16.mxu0 %v1221_v1  ;;  %v595_v30 = vsel %vm594_vm3, 1, %v1223_v12 }
  0x14   : > { %1142 = vmatmul.mubr.msk.bf16.vlgmr.msra.gmra.mxu1 %vm483_vm1, %v459_v5  ;;  %v599_v31 = vrot.slane %v595_v30, %v598_v29 }
  0x15   : > { %1134 = vmatmul.mubr.msk.bf16.vlgmr.msra.gmra.mxu0 %vm483_vm1, %v1336_v6  ;;  %1153 = vmatprep.mubr.msk.bf16.mxu1 %vm1222_vm0, %v1221_v1 }
  0x16   : > { %1147 = vmatprep.mubr.msk.bf16.mxu0 %vm1222_vm0, %v1221_v1  ;;  %vm600_vm4 = vcmp.eq.s32.totalorder %v599_v31, 1 }
  0x17   : > { %vm606_vm6 = vmor %vm600_vm4, %vm605_vm5 }
  0xd4   : > { %v587_v9 = vpop.f32.mrf.mxu1 }
  0xd5   : > { %v588_v10 = vadd.f32 %v1094_v7, %v587_v9  ;;  %v521_v11 = vpop.f32.mrf.mxu0 }
  0xd6   : > { %v1143_v13 = vpop.f32.mrf.mxu1  ;;  %v522_v14 = vadd.f32 %v1090_v8, %v521_v11  ;;  %v1201_v8 = vld [vmem:[%s1418_s8] sm:$0xff]  }
  0xd7   : > { %v1349_v15 = vpack.c.bf16 %v588_v10, %v588_v10  ;;  %v1135_v16 = vpop.f32.mrf.mxu0 }
  0xd8   : > { %v590_v17 = vpop.f32.mrf.mxu1  ;;  %v607_v18 = vpack.c.bf16 %v522_v14, %v522_v14 }
  0xd9   : > { %730 = vrot.lane.b32.xlu0 %v1349_v15, %s1224_s26  ;;  %v614_v19 = vsel %vm609_vm2, %v1349_v15, 0  ;;  %v524_v20 = vpop.f32.mrf.mxu0 }
  0xda   : > { %v1144_v21 = vpop.f32.mrf.mxu1  ;;  %1146 = vmatpush3.bf16.xpose.msra.mxu0 %v614_v19 }
  0xdb   : > { %v1136_v22 = vpop.f32.mrf.mxu0  ;;  %1157 = vmatprep.subr.bf16.mxu0 %v1221_v1 }
  0xdd   : > { %728 = vrot.lane.b32.xlu0 %v607_v18, %s1224_s26  ;;  %s452_s26 = scalar_lea.vmem %s1413_s3, %s1088_s23 }
  0xde   : > { %v981_v6 = vld [vmem:[%s452_s26] sm:$0x7f] }
  0xe1   : > { %1148 = vmatmul.mubr.msk.bf16.vlgmr.msra.gmra.mxu0 %vm609_vm2, %v607_v18 }
  0xe2   : > { %1159 = vmatprep.mubr.msk.bf16.mxu0 %vm1222_vm0, %v1221_v1 }
 0x14b   : > { %v731_v23 = vpop.permute.xlu0 %730 }
 0x14c   : > { %v736_v24 = vsel %vm609_vm2, %v731_v23, 0 }
 0x14d   : > { %1158 = vmatpush3.bf16.xpose.msra.mxu0 %v736_v24 }
 0x14e   : > { %1169 = vmatprep.subr.bf16.mxu0 %v1221_v1 }
 0x14f   : > { %v729_v25 = vpop.permute.xlu0 %728 }
 0x154   : > { %1160 = vmatmul.mubr.msk.bf16.vlgmr.msra.gmra.mxu0 %vm609_vm2, %v729_v25 }
 0x155   : > { %1171 = vmatprep.mubr.msk.bf16.mxu0 %vm1222_vm0, %v1221_v1  ;;  %1170 = vmatpush3.bf16.msra.mxu0 %v1202_v0 }
 0x1a1   : > { %v650_v33 = vpop.f32.mrf.mxu0 }
 0x1a2   : > { %v656_v34 = vsel %vm606_vm6, -1e+30, %v650_v33 }
 0x1a3   : > { %v1149_v35 = vpop.f32.mrf.mxu0  ;;  %v658_v36 = vsel %vm657_vm7, %v656_v34, -inf }
 0x1a4   : > { %659 = vmax.xlane.f32.xlu1 %v658_v36 }
 0x1a5   : > { %v653_v37 = vpop.f32.mrf.mxu0 }
 0x1a7   : > { %v1150_v38 = vpop.f32.mrf.mxu0 }
 0x214   : > { %v772_v39 = vpop.f32.mrf.mxu0 }
 0x215   : > { %v778_v40 = vsel %vm606_vm6, -1e+30, %v772_v39 }
 0x216   : > { %v1161_v41 = vpop.f32.mrf.mxu0  ;;  %v779_v42 = vsel %vm657_vm7, %v778_v40, -inf }
 0x217   : > { %780 = vmax.xlane.f32.xlu1 %v779_v42  ;;  %v1107_v42 = vld [vmem:[%s1420_s10] ss:$0 sm:$0xff] }
 0x218   : > { %v775_v43 = vpop.f32.mrf.mxu0 }
 0x21a   : > { %v1162_v44 = vpop.f32.mrf.mxu0 }
 0x21b   : > { %v1108_v44 = vld [vmem:[%s1421_s11] ss:$0 sm:$0xff] }
 0x228   : > { %671 = vrot.lane.b32.xlu1 %v1349_v15, %s1225_s30 }
 0x22d   : > { %v660_v45 = vpop.xlane.xlu1 %659 }
 0x22e   : > { %v661_v46 = vsub.f32 %v656_v34, %v660_v45 }
 0x230   : > { %v662_v47 = vmul.f32 1.442695, %v661_v46 }
 0x232   : > { %1203 = vpow2.f32 %v662_v47 }
 0x23f   : > { %v1204_v48 = vpop.eup %1203 }
 0x240   : > { %v664_v49 = vsel %vm657_vm7, %v1204_v48, 0.0 }
 0x241   : > { %665 = vadd.xlane.f32.xlu0 %v664_v49  ;;  %v992_v49 = vld [vmem:[%s456_s15] sm:$0xf] }
 0x2a0   : > { %v781_v52 = vpop.xlane.xlu1 %780 }
 0x2a1   : > { %v782_v53 = vsub.f32 %v778_v40, %v781_v52 }
 0x2a3   : > { %v783_v55 = vmul.f32 1.442695, %v782_v53 }
 0x2a4   : > { %v672_v56 = vpop.permute.xlu1 %671 }
 0x2a5   : > { %1205 = vpow2.f32 %v783_v55  ;;  %v682_v57 = vand.u32 %v680_v54, %v672_v56 }
 0x2a7   : > { %1152 = vmatpush3.bf16.msra.mxu1 %v682_v57 }
 0x2a8   : > { %1163 = vmatprep.subr.bf16.mxu1 %v1221_v1 }
 0x2b2   : > { %v1206_v58 = vpop.eup %1205 }
 0x2b3   : > { %v785_v59 = vsel %vm657_vm7, %v1206_v58, 0.0 }
 0x2b4   : > { %786 = vadd.xlane.f32.xlu1 %v785_v59 }
 0x2c5   : > { %791 = vrot.lane.b32.xlu1 %v1349_v15, %s1227_s14 }
 0x2ca   : > { %v666_v60 = vpop.xlane.xlu0 %665 }
 0x2cb   : > { %1207 = vrcp.f32 %v666_v60 }
 0x2d8   : > { %v1208_v61 = vpop.eup %1207 }
 0x2d9   : > { %v668_v62 = vmul.f32 %v1208_v61, %v1204_v48 }
 0x2db   : > { %v669_v63 = vpack.c.bf16 %v668_v62, %v668_v62 }
 0x2dd   : > { %1154 = vmatmul.mubr.msk.bf16.vlgmr.msra.gmra.mxu1 %vm673_vm10, %v669_v63 }
 0x2de   : > { %1165 = vmatprep.mubr.msk.bf16.mxu1 %vm1222_vm0, %v1221_v1 }
 0x33d   : > { %v787_v2 = vpop.xlane.xlu1 %786 }
 0x33e   : > { %1209 = vrcp.f32 %v787_v2 }
 0x341   : > { %v792_v3 = vpop.permute.xlu1 %791 }
 0x342   : > { %v797_v4 = vand.u32 %v792_v3, %v680_v54 }
 0x344   : > { %1164 = vmatpush3.bf16.msra.mxu1 %v797_v4 }
 0x345   : > { %1175 = vmatprep.subr.bf16.mxu1 %v1221_v1 }
 0x34b   : > { %v1210_v5 = vpop.eup %1209 }
 0x34c   : > { %v789_v7 = vmul.f32 %v1210_v5, %v1206_v58 }
 0x34e   : > { %v790_v9 = vpack.c.bf16 %v789_v7, %v789_v7 }
 0x350   : > { %1166 = vmatmul.mubr.msk.bf16.vlgmr.msra.gmra.mxu1 %vm673_vm10, %v790_v9 }
 0x351   : > { %1176 = vmatpush3.bf16.msra.mxu1 %v1201_v8  ;;  %1177 = vmatprep.mubr.msk.bf16.mxu1 %vm1222_vm0, %v1221_v1  ;;  %v1106_v1 = vld [vmem:[%s1419_s9] ss:$0 sm:$0xff] }
 0x39d   : > { %v718_v10 = vpop.f32.mrf.mxu1 }
 0x39e   : > { %v724_v11 = vpack.c.bf16 %v718_v10, %v718_v10 }
 0x39f   : > { %v1155_v12 = vpop.f32.mrf.mxu1 }
 0x3a0   : > { %1178 = vmatmul.mubr.msk.bf16.vlgmr.msra.gmra.mxu1 %vm609_vm2, %v724_v11 }
 0x3a1   : > { %v721_v13 = vpop.f32.mrf.mxu1 }
 0x3a3   : > { %v1156_v14 = vpop.f32.mrf.mxu1 }
 0x410   : > { %v833_v15 = vpop.f32.mrf.mxu1 }
 0x411   : > { %v839_v16 = vpack.c.bf16 %v833_v15, %v833_v15 }
 0x412   : > { %v1167_v17 = vpop.f32.mrf.mxu1 }
 0x413   : > { %1172 = vmatmul.mubr.msk.bf16.vlgmr.msra.gmra.mxu0 %vm609_vm2, %v839_v16 }
 0x414   : > { %v836_v18 = vpop.f32.mrf.mxu1 }
 0x416   : > { %v1168_v19 = vpop.f32.mrf.mxu1 }
 0x460   : > { %v934_v20 = vpop.f32.mrf.mxu1 }
 0x462   : > { %v1179_v21 = vpop.f32.mrf.mxu1 }
 0x464   : > { %v937_v22 = vpop.f32.mrf.mxu1 }
 0x466   : > { %v1180_v23 = vpop.f32.mrf.mxu1 }
 0x4d3   : > { %v885_v24 = vpop.f32.mrf.mxu0 }
 0x4d4   : > { %v935_v25 = vadd.f32 %v934_v20, %v885_v24 }
 0x4d5   : > { %v1173_v27 = vpop.f32.mrf.mxu0 }
 0x4d6   : > { %v947_v28 = vadd.f32 %v1106_v1, %v935_v25 }
 0x4d7   : > { %v888_v29 = vpop.f32.mrf.mxu0 }
 0x4d8   : > { %v949_v30 = vadd.f32 %v948_v26, %v947_v28 }
 0x4d9   : > { %v1174_v31 = vpop.f32.mrf.mxu0 }
 0x4da   : > { %v951_v32 = vsel %vm950_vm11, %v949_v30, 0.0 }
 0x4db   : > { %952 = vadd.xlane.f32.xlu1 %v951_v32 }
 0x564   : > { %v953_v33 = vpop.xlane.xlu1 %952 }
 0x565   : > { %v955_v34 = vmul.f32 0.03125, %v953_v33 }
 0x567   : > { %v956_v35 = vsub.f32 %v949_v30, %v955_v34 }
 0x569   : > { %v957_v36 = vmul.f32 %v956_v35, %v956_v35 }
 0x56b   : > { %v958_v37 = vsel %vm950_vm11, %v957_v36, 0.0 }
 0x56c   : > { %959 = vadd.xlane.f32.xlu0 %v958_v37 }
 0x582   : > { %984 = vperm.xlu0 %1196, %v981_v6  }
 0x5f5   : > { %v960_v38 = vpop.xlane.xlu0 %959 }
 0x5f6   : > { %v961_v39 = vmul.f32 0.03125, %v960_v38 }
 0x5f8   : > { %v962_v40 = vadd.f32 1e-05, %v961_v39 }
 0x5fa   : > { %1211 = vrsqrt.f32 %v962_v40 }
 0x5fd   : > { %v985_v46 = vpop.permute.xlu0 %984 }
 0x607   : > { %v1212_v41 = vpop.eup %1211 }
 0x608   : > { %v964_v43 = vmul.f32 %v1212_v41, %v956_v35 }
 0x60a   : > { %v972_v45 = vmul.f32 %v1107_v42, %v964_v43 }
 0x60c   : > { %v980_v47 = vadd.f32 %v1108_v44, %v972_v45 }
 0x60e   : > { %v987_v48 = vmul.f32 %v985_v46, %v980_v47 }
 0x610   : > { %v988_v50 = vpack.c.bf16 %v987_v48, %v987_v48 }
 0x612   : > { %v993_v51 = vsel %vm991_vm14, %v988_v50, %v992_v49 }
 0x613   : > { %994 = vst [vmem:[%s456_s15] sm:$0xf] %v993_v51 }
 0x614 PF: > { %s22_s21 = sadd.s32 1, %s1219_s21  }
 0x615   : > { %p19_p4 = scmp.ge.s32.totalorder %s22_s21, 4  }
 0x617   :  { %21 = sbr.rel (!%p19_p4) target bundleno = 1 (0x1), region = 107 }

// kernel: _lambda_.16
= control target key start
LH: loop header
LB: loop body
LE: loop exit
PB: predicated region body
PF: predicated region fallthrough
CT: control target
= control target key end

     0   :  { %s1282_s21 = smov 0   ;;  %s1401_s0 = inlined_call_operand.vmem [shape: bf16[2,7,32], index: 0, kind: input, shape index: {}]   ;;  %s1402_s1 = inlined_call_operand.vmem [shape: bf16[2,8,32], index: 1, kind: input, shape index: {}]   ;;  %s1403_s2 = inlined_call_operand.vmem [shape: s32[2,1,8], index: 2, kind: input, shape index: {}]   ;;  %s1404_s3 = inlined_call_operand.vmem [shape: f32[2,7,1], index: 3, kind: input, shape index: {}]   ;;  %s1405_s4 = inlined_call_operand.vmem [shape: bf16[32,32], index: 4, kind: input, shape index: {}]   ;;  %s1406_s5 = inlined_call_operand.vmem [shape: f32[1,32], index: 5, kind: input, shape index: {}]   ;;  %s1407_s6 = inlined_call_operand.vmem [shape: bf16[32,64], index: 6, kind: input, shape index: {}]   ;;  %s1408_s7 = inlined_call_operand.vmem [shape: f32[1,64], index: 7, kind: input, shape index: {}]   ;;  %s1409_s8 = inlined_call_operand.vmem [shape: bf16[32,32], index: 8, kind: input, shape index: {}]   ;;  %s1410_s9 = inlined_call_operand.vmem [shape: f32[1,32], index: 9, kind: input, shape index: {}]   ;;  %s1411_s10 = inlined_call_operand.vmem [shape: f32[1,32], index: 10, kind: input, shape index: {}]   ;;  %s1412_s11 = inlined_call_operand.vmem [shape: f32[1,32], index: 11, kind: input, shape index: {}]   ;;  %s1413_s12 = inlined_call_operand.vmem [shape: bf16[2,7,32], index: 12, kind: output, shape index: {}]  }
   0x1 LB: > { %s1072_s22 = sadd.s32 4294967295, %s1209_s21   ;;  %p1076_p0 = scmp.ge.s32.totalorder %s1209_s21, 1  ;;  %s1209_s21 = sphi %s1282_s21, %s22_s21  }
   0x2   : > { %p387_p1 = scmp.lt.s32.totalorder %s1209_s21, 3 }
   0x4   : > { %p388_p2 = pnand %p1076_p0, %p387_p1 }
   0x5   : > { %p438_p3 = scmp.lt.s32.totalorder (!%p388_p2), %s1072_s22, 1  ;;  %s1214_s26 = smov (!%p388_p2), 112  }
   0x6   : > { %391 = sbr.rel (%p388_p2) target bundleno = 1556 (0x614), region = 68  ;;  %s1215_s30 = smov (!%p388_p2), 96  }
   0x7   : > { %s1216_s14 = smov (!%p388_p2), 80  }
   0xb   : > { %v1187_v0 = vld [vmem:[%s1407_s6 + $0x8] sm:$0xff]   ;;  %v1211_v1 = vmov 0.0   ;;  %v1189_v3 = vld [vmem:[%s1407_s6] sm:$0xff]   ;;  %vm1212_vm0 = vmmov 0   ;;  %s1415_s22 = smov (!%p438_p3, %s1072_s22), 1  ;;  %vm483_vm1 = vcmask 261120   ;;  %v596_v26 = vlaneseq }
   0xc   : > { %1128 = vmatprep.subr.bf16.mxu1 %v1211_v1  ;;  %1120 = vmatprep.subr.bf16.mxu0 %v1211_v1  ;;  %v1188_v2 = vld [vmem:[%s1405_s4 + $0x8] sm:$0xff]   ;;  %v1190_v4 = vld [vmem:[%s1405_s4] sm:$0xff]   ;;  %s1313_s13 = sshll.u32 %s1415_s22, 2  ;;  %v1213_v12 = vmov 0   ;;  %vm603_vm2 = vcmask 130048   ;;  %s448_s29 = scalar_lea.vmem %s1403_s2, %s1415_s22  ;;  %vm651_vm5 = vcmask 63488  }
   0xd   : > { %1129 = vmatpush3.bf16.msra.mxu1 %v1187_v0  ;;  %1132 = vmatprep.mubr.msk.bf16.mxu1 %vm1212_vm0, %v1211_v1  ;;  %s445_s16 = scalar_lea.vmem %s1402_s1, %s1313_s13  ;;  %s441_s19 = scalar_lea.vmem %s1401_s0, %s1313_s13  ;;  %v1085_v7 = vld [vmem:[%s1408_s7] ss:$0 sm:$0xff]  ;;  %v597_v28 = vshrl.u32 %v596_v26, 7  ;;  %vm671_vm6 = vcmask 1043456   ;;  %vm667_vm7 = vcmask 64512   ;;  %v1192_v60 = vld [vmem:[%s1409_s8 + $0x8] sm:$0xff]  }
   0xe   : > { %1121 = vmatpush3.bf16.msra.mxu0 %v1188_v2  ;;  %1130 = vmatprep.subr.bf16.mxu1 %v1211_v1  ;;  %v459_v5 = vld [vmem:[%s445_s16] sm:$0xf]  ;;  %vm941_vm8 = vcmask 260096   ;;  %s1079_s23 = sshll.u32 %s1415_s22, 3  ;;  %s456_s15 = scalar_lea.vmem %s1413_s12, %s1313_s13  ;;  %vm980_vm9 = vcmask 257024  }
   0xf   : > { %1122 = vmatprep.subr.bf16.mxu0 %v1211_v1  ;;  %1124 = vmatprep.mubr.msk.bf16.mxu0 %vm1212_vm0, %v1211_v1  ;;  %v1325_v6 = vld [vmem:[%s441_s19] sm:$0xf]  ;;  %v598_v29 = vsub.s32 0, %v597_v28  ;;  %vm981_vm10 = vsmask.f32 3328 }
  0x10   : > { %v1081_v8 = vld [vmem:[%s1406_s5] ss:$0 sm:$0xff]  ;;  %1186 = vset.pattern.permute.xlu0 %v1213_v12  ;;  %vm982_vm11 = vmand %vm980_vm9, %vm981_vm10 }
  0x11   : > { %1131 = vmatpush3.bf16.msra.mxu1 %v1189_v3  ;;  %v593_v27 = vld [vmem:[%s448_s29] sm:$0x1] }
  0x12   : > { %1123 = vmatpush3.bf16.msra.mxu0 %v1190_v4  ;;  %1142 = vmatprep.subr.bf16.mxu1 %v1211_v1  ;;  %vm594_vm3 = vcmp.ne.s32.totalorder %v593_v27, 0  ;;  %v1191_v3 = vld [vmem:[%s1409_s8] sm:$0xff]  }
  0x13   : > { %1136 = vmatprep.subr.bf16.mxu0 %v1211_v1  ;;  %v595_v30 = vsel %vm594_vm3, 1, %v1213_v12 }
  0x14   : > { %1133 = vmatmul.mubr.msk.bf16.vlgmr.msra.gmra.mxu1 %vm483_vm1, %v459_v5  ;;  %v599_v31 = vrot.slane %v595_v30, %v598_v29 }
  0x15   : > { %1125 = vmatmul.mubr.msk.bf16.vlgmr.msra.gmra.mxu0 %vm483_vm1, %v1325_v6  ;;  %1144 = vmatprep.mubr.msk.bf16.mxu1 %vm1212_vm0, %v1211_v1 }
  0x16   : > { %1138 = vmatprep.mubr.msk.bf16.mxu0 %vm1212_vm0, %v1211_v1  ;;  %vm600_vm4 = vcmp.eq.s32.totalorder %v599_v31, 1 }
  0xd4   : > { %v587_v9 = vpop.f32.mrf.mxu1 }
  0xd5   : > { %v588_v10 = vadd.f32 %v1085_v7, %v587_v9  ;;  %v521_v11 = vpop.f32.mrf.mxu0 }
  0xd6   : > { %v1134_v13 = vpop.f32.mrf.mxu1  ;;  %v522_v14 = vadd.f32 %v1081_v8, %v521_v11 }
  0xd7   : > { %v1338_v15 = vpack.c.bf16 %v588_v10, %v588_v10  ;;  %v1126_v16 = vpop.f32.mrf.mxu0 }
  0xd8   : > { %v590_v17 = vpop.f32.mrf.mxu1  ;;  %v601_v18 = vpack.c.bf16 %v522_v14, %v522_v14 }
  0xd9   : > { %721 = vrot.lane.b32.xlu0 %v1338_v15, %s1214_s26  ;;  %v608_v19 = vsel %vm603_vm2, %v1338_v15, 0  ;;  %v524_v20 = vpop.f32.mrf.mxu0 }
  0xda   : > { %v1135_v21 = vpop.f32.mrf.mxu1  ;;  %1137 = vmatpush3.bf16.xpose.msra.mxu0 %v608_v19 }
  0xdb   : > { %v1127_v22 = vpop.f32.mrf.mxu0  ;;  %1148 = vmatprep.subr.bf16.mxu0 %v1211_v1 }
  0xdc   : > { %v939_v22 = vunpack.c.l.bf16 %v1325_v6 }
  0xdd   : > { %719 = vrot.lane.b32.xlu0 %v601_v18, %s1214_s26  ;;  %s452_s26 = scalar_lea.vmem %s1404_s3, %s1079_s23 }
  0xde   : > { %v972_v6 = vld [vmem:[%s452_s26] sm:$0x7f] }
  0xe1   : > { %1139 = vmatmul.mubr.msk.bf16.vlgmr.msra.gmra.mxu0 %vm603_vm2, %v601_v18 }
  0xe2   : > { %1150 = vmatprep.mubr.msk.bf16.mxu0 %vm1212_vm0, %v1211_v1 }
 0x14b   : > { %v722_v23 = vpop.permute.xlu0 %721 }
 0x14c   : > { %v727_v24 = vsel %vm603_vm2, %v722_v23, 0 }
 0x14d   : > { %1149 = vmatpush3.bf16.xpose.msra.mxu0 %v727_v24 }
 0x14e   : > { %1160 = vmatprep.subr.bf16.mxu0 %v1211_v1 }
 0x14f   : > { %v720_v25 = vpop.permute.xlu0 %719 }
 0x154   : > { %1151 = vmatmul.mubr.msk.bf16.vlgmr.msra.gmra.mxu0 %vm603_vm2, %v720_v25 }
 0x155   : > { %1162 = vmatprep.mubr.msk.bf16.mxu0 %vm1212_vm0, %v1211_v1  ;;  %1161 = vmatpush3.bf16.msra.mxu0 %v1192_v60 }
 0x1a1   : > { %v644_v32 = vpop.f32.mrf.mxu0 }
 0x1a2   : > { %v650_v33 = vsel %vm600_vm4, -1e+30, %v644_v32 }
 0x1a3   : > { %v1140_v34 = vpop.f32.mrf.mxu0  ;;  %v652_v35 = vsel %vm651_vm5, %v650_v33, -inf }
 0x1a4   : > { %653 = vmax.xlane.f32.xlu1 %v652_v35 }
 0x1a5   : > { %v647_v36 = vpop.f32.mrf.mxu0 }
 0x1a7   : > { %v1141_v37 = vpop.f32.mrf.mxu0 }
 0x214   : > { %v763_v38 = vpop.f32.mrf.mxu0 }
 0x215   : > { %v769_v39 = vsel %vm600_vm4, -1e+30, %v763_v38  ;;  %v1098_v38 = vld [vmem:[%s1411_s10] ss:$0 sm:$0xff] }
 0x216   : > { %v1152_v40 = vpop.f32.mrf.mxu0  ;;  %v770_v41 = vsel %vm651_vm5, %v769_v39, -inf }
 0x217   : > { %771 = vmax.xlane.f32.xlu1 %v770_v41  ;;  %v1099_v40 = vld [vmem:[%s1412_s11] ss:$0 sm:$0xff] }
 0x218   : > { %v766_v42 = vpop.f32.mrf.mxu0 }
 0x21a   : > { %v1153_v43 = vpop.f32.mrf.mxu0 }
 0x228   : > { %665 = vrot.lane.b32.xlu1 %v1338_v15, %s1215_s30 }
 0x22d   : > { %v654_v44 = vpop.xlane.xlu1 %653 }
 0x22e   : > { %v655_v45 = vsub.f32 %v650_v33, %v654_v44 }
 0x230   : > { %v656_v46 = vmul.f32 1.442695, %v655_v45  ;;  %v983_v45 = vld [vmem:[%s456_s15] sm:$0xf] }
 0x232   : > { %1193 = vpow2.f32 %v656_v46 }
 0x23f   : > { %v1194_v47 = vpop.eup %1193 }
 0x240   : > { %v658_v48 = vsel %vm651_vm5, %v1194_v47, 0.0 }
 0x241   : > { %659 = vadd.xlane.f32.xlu0 %v658_v48 }
 0x2a0   : > { %v772_v49 = vpop.xlane.xlu1 %771 }
 0x2a1   : > { %v773_v50 = vsub.f32 %v769_v39, %v772_v49 }
 0x2a3   : > { %v774_v51 = vmul.f32 1.442695, %v773_v50 }
 0x2a4   : > { %v666_v52 = vpop.permute.xlu1 %665 }
 0x2a5   : > { %1195 = vpow2.f32 %v774_v51  ;;  %v673_v53 = vsel %vm671_vm6, %v666_v52, 0 }
 0x2a6   : > { %1143 = vmatpush3.bf16.msra.mxu1 %v673_v53 }
 0x2a7   : > { %1154 = vmatprep.subr.bf16.mxu1 %v1211_v1 }
 0x2b2   : > { %v1196_v54 = vpop.eup %1195 }
 0x2b3   : > { %v776_v55 = vsel %vm651_vm5, %v1196_v54, 0.0 }
 0x2b4   : > { %777 = vadd.xlane.f32.xlu1 %v776_v55 }
 0x2c5   : > { %782 = vrot.lane.b32.xlu1 %v1338_v15, %s1216_s14 }
 0x2ca   : > { %v660_v56 = vpop.xlane.xlu0 %659 }
 0x2cb   : > { %1197 = vrcp.f32 %v660_v56 }
 0x2d8   : > { %v1198_v57 = vpop.eup %1197 }
 0x2d9   : > { %v662_v58 = vmul.f32 %v1198_v57, %v1194_v47 }
 0x2db   : > { %v663_v59 = vpack.c.bf16 %v662_v58, %v662_v58 }
 0x2dd   : > { %1145 = vmatmul.mubr.msk.bf16.vlgmr.msra.gmra.mxu1 %vm667_vm7, %v663_v59 }
 0x2de   : > { %1156 = vmatprep.mubr.msk.bf16.mxu1 %vm1212_vm0, %v1211_v1 }
 0x33d   : > { %v778_v61 = vpop.xlane.xlu1 %777 }
 0x33e   : > { %1199 = vrcp.f32 %v778_v61 }
 0x341   : > { %v783_v62 = vpop.permute.xlu1 %782 }
 0x342   : > { %v788_v63 = vsel %vm671_vm6, %v783_v62, 0 }
 0x343   : > { %1155 = vmatpush3.bf16.msra.mxu1 %v788_v63 }
 0x344   : > { %1166 = vmatprep.subr.bf16.mxu1 %v1211_v1 }
 0x34b   : > { %v1200_v0 = vpop.eup %1199 }
 0x34c   : > { %v780_v2 = vmul.f32 %v1200_v0, %v1196_v54 }
 0x34e   : > { %v781_v4 = vpack.c.bf16 %v780_v2, %v780_v2 }
 0x350   : > { %1157 = vmatmul.mubr.msk.bf16.vlgmr.msra.gmra.mxu1 %vm667_vm7, %v781_v4 }
 0x351   : > { %1167 = vmatpush3.bf16.msra.mxu1 %v1191_v3  ;;  %1168 = vmatprep.mubr.msk.bf16.mxu1 %vm1212_vm0, %v1211_v1  ;;  %v1097_v1 = vld [vmem:[%s1410_s9] ss:$0 sm:$0xff] }
 0x39d   : > { %v709_v5 = vpop.f32.mrf.mxu1 }
 0x39e   : > { %v715_v7 = vpack.c.bf16 %v709_v5, %v709_v5 }
 0x39f   : > { %v1146_v8 = vpop.f32.mrf.mxu1 }
 0x3a0   : > { %1169 = vmatmul.mubr.msk.bf16.vlgmr.msra.gmra.mxu1 %vm603_vm2, %v715_v7 }
 0x3a1   : > { %v712_v9 = vpop.f32.mrf.mxu1 }
 0x3a3   : > { %v1147_v10 = vpop.f32.mrf.mxu1 }
 0x410   : > { %v824_v11 = vpop.f32.mrf.mxu1 }
 0x411   : > { %v830_v12 = vpack.c.bf16 %v824_v11, %v824_v11 }
 0x412   : > { %v1158_v13 = vpop.f32.mrf.mxu1 }
 0x413   : > { %1163 = vmatmul.mubr.msk.bf16.vlgmr.msra.gmra.mxu0 %vm603_vm2, %v830_v12 }
 0x414   : > { %v827_v14 = vpop.f32.mrf.mxu1 }
 0x416   : > { %v1159_v15 = vpop.f32.mrf.mxu1 }
 0x460   : > { %v925_v16 = vpop.f32.mrf.mxu1 }
 0x462   : > { %v1170_v17 = vpop.f32.mrf.mxu1 }
 0x464   : > { %v928_v18 = vpop.f32.mrf.mxu1 }
 0x466   : > { %v1171_v19 = vpop.f32.mrf.mxu1 }
 0x4d3   : > { %v876_v20 = vpop.f32.mrf.mxu0 }
 0x4d4   : > { %v926_v21 = vadd.f32 %v925_v16, %v876_v20 }
 0x4d5   : > { %v1164_v23 = vpop.f32.mrf.mxu0 }
 0x4d6   : > { %v938_v24 = vadd.f32 %v1097_v1, %v926_v21 }
 0x4d7   : > { %v879_v25 = vpop.f32.mrf.mxu0 }
 0x4d8   : > { %v940_v26 = vadd.f32 %v939_v22, %v938_v24 }
 0x4d9   : > { %v1165_v27 = vpop.f32.mrf.mxu0 }
 0x4da   : > { %v942_v28 = vsel %vm941_vm8, %v940_v26, 0.0 }
 0x4db   : > { %943 = vadd.xlane.f32.xlu1 %v942_v28 }
 0x564   : > { %v944_v29 = vpop.xlane.xlu1 %943 }
 0x565   : > { %v946_v30 = vmul.f32 0.03125, %v944_v29 }
 0x567   : > { %v947_v31 = vsub.f32 %v940_v26, %v946_v30 }
 0x569   : > { %v948_v32 = vmul.f32 %v947_v31, %v947_v31 }
 0x56b   : > { %v949_v33 = vsel %vm941_vm8, %v948_v32, 0.0 }
 0x56c   : > { %950 = vadd.xlane.f32.xlu0 %v949_v33 }
 0x582   : > { %975 = vperm.xlu0 %1186, %v972_v6  }
 0x5f5   : > { %v951_v34 = vpop.xlane.xlu0 %950 }
 0x5f6   : > { %v952_v35 = vmul.f32 0.03125, %v951_v34 }
 0x5f8   : > { %v953_v36 = vadd.f32 1e-05, %v952_v35 }
 0x5fa   : > { %1201 = vrsqrt.f32 %v953_v36 }
 0x5fd   : > { %v976_v42 = vpop.permute.xlu0 %975 }
 0x607   : > { %v1202_v37 = vpop.eup %1201 }
 0x608   : > { %v955_v39 = vmul.f32 %v1202_v37, %v947_v31 }
 0x60a   : > { %v963_v41 = vmul.f32 %v1098_v38, %v955_v39 }
 0x60c   : > { %v971_v43 = vadd.f32 %v1099_v40, %v963_v41 }
 0x60e   : > { %v978_v44 = vmul.f32 %v976_v42, %v971_v43 }
 0x610   : > { %v979_v46 = vpack.c.bf16 %v978_v44, %v978_v44 }
 0x612   : > { %v984_v47 = vsel %vm982_vm11, %v979_v46, %v983_v45 }
 0x613   : > { %985 = vst [vmem:[%s456_s15] sm:$0xf] %v984_v47 }
 0x614 PF: > { %s22_s21 = sadd.s32 1, %s1209_s21  }
 0x615   : > { %p19_p4 = scmp.ge.s32.totalorder %s22_s21, 4  }
 0x617   :  { %21 = sbr.rel (!%p19_p4) target bundleno = 1 (0x1), region = 107 }

// kernel: _lambda_.21
= control target key start
LH: loop header
LB: loop body
LE: loop exit
PB: predicated region body
PF: predicated region fallthrough
CT: control target
= control target key end

     0   :  { %v145_v1 = vmov 0.0   ;;  %vm146_vm0 = vmmov 0   ;;  %s177_s0 = inlined_call_operand.vmem [shape: bf16[14,32], index: 0, kind: input, shape index: {}]   ;;  %s178_s1 = inlined_call_operand.vmem [shape: bf16[32,32], index: 1, kind: input, shape index: {}]   ;;  %s179_s2 = inlined_call_operand.hbm [shape: f32[14,32], index: 2, kind: output, shape index: {}]  }
   0x1   :  { %v120_v0 = vld [vmem:[%s178_s1 + $0x8] sm:$0xff]   ;;  %107 = vmatprep.subr.bf16.mxu0 %v145_v1  ;;  %v121_v2 = vld [vmem:[%s178_s1] sm:$0xff]   ;;  %111 = vmatprep.mubr.msk.bf16.mxu0 %vm146_vm0, %v145_v1 }
   0x2   :  { %108 = vmatpush3.bf16.msra.mxu0 %v120_v0 }
   0x3   :  { %109 = vmatprep.subr.bf16.mxu0 %v145_v1 }
   0x4   :  { %7 = vsyncpa [#allocation3], 0  ;;  %v122_v3 = vld [vmem:[%s177_s0] sm:$0x7f]   ;;  %vm36_vm1 = vcmask 261120   ;;  %s147_s15 = smov [#allocation2]  }
   0x5   :  { %s89_s16 = sshll.u32 %s147_s15, 4  ;;  %vm82_vm2 = vcmask 259072   ;;  %s90_s16 = int_to_ptr.vmem [resolvable:$true] %s89_s16 }
   0x6   :  { %110 = vmatpush3.bf16.msra.mxu0 %v121_v2  ;;  %s123_s1 = scalar_lea.vmem %s90_s16, 256  ;;  %p128_p1 = scmp.lt.s32.totalorder %s90_s16, %s90_s16 }
   0x7   :  { %p124_p0 = scmp.ne.s32.totalorder %s90_s16, %s123_s1  ;;  %p129_p2 = scmp.lt.s32.totalorder %s123_s1, %s123_s1 }
   0x9   :  { %112 = vmatmul.mubr.msk.bf16.vlgmr.msra.gmra.mxu0 %vm36_vm1, %v122_v3  ;;  %p130_p3 = por %p129_p2, %p128_p1 }
   0xb   :  { %p131_p4 = pnand %p130_p3, %p124_p0 }
  0xc9   :  { %v74_v4 = vpop.f32.mrf.mxu0 }
  0xca   :  { %81 = vst.msk [vmem:[#allocation2] sm:$0xff] %vm36_vm1, %v74_v4 }
  0xcb   :  { %v113_v5 = vpop.f32.mrf.mxu0 }
  0xcd   :  { %v77_v6 = vpop.f32.mrf.mxu0 }
  0xce   :  { %83 = vst.msk [vmem:[#allocation2 + $0x8] sm:$0x3f] %vm82_vm2, %v77_v6 }
  0xcf   :  { %v114_v7 = vpop.f32.mrf.mxu0 }
  0xd0   :  { %134 = shalt.err (!%p131_p4)
}
  0xd1   :  { %s148_s0 = smov 128   ;;  %s149_s17 = smov 8  }
  0xd2   :  { %95 = dma.vmem_to_hbm [thread:$0]  %s90_s16, 256, %s179_s2, [#allocation3], %s148_s0, %s148_s0, %s149_s17  }
  0xd3   :  { %143 = dma.done.wait [#allocation3], 256  }
  0xd4   :  { %144 = vsyncadd [#allocation3], 4294967040 }
  0xd5   :  { %99 = vsyncpa [#allocation3], 1 }

// kernel: _lambda_.17
= control target key start
LH: loop header
LB: loop body
LE: loop exit
PB: predicated region body
PF: predicated region fallthrough
CT: control target
= control target key end

     0   :  { %s711_s27 = smov 0   ;;  %s771_s0 = inlined_call_operand.vmem [shape: bf16[2,7,32], index: 0, kind: input, shape index: {}]   ;;  %s772_s1 = inlined_call_operand.vmem [shape: f32[2,7,1], index: 1, kind: input, shape index: {}]   ;;  %s773_s2 = inlined_call_operand.vmem [shape: bf16[32,64], index: 2, kind: input, shape index: {}]   ;;  %s774_s3 = inlined_call_operand.vmem [shape: f32[1,64], index: 3, kind: input, shape index: {}]   ;;  %s775_s4 = inlined_call_operand.vmem [shape: bf16[64,32], index: 4, kind: input, shape index: {}]   ;;  %s776_s5 = inlined_call_operand.vmem [shape: f32[1,32], index: 5, kind: input, shape index: {}]   ;;  %s777_s6 = inlined_call_operand.vmem [shape: f32[1,32], index: 6, kind: input, shape index: {}]   ;;  %s778_s7 = inlined_call_operand.vmem [shape: f32[1,32], index: 7, kind: input, shape index: {}]   ;;  %s779_s8 = inlined_call_operand.vmem [shape: bf16[2,7,32], index: 8, kind: output, shape index: {}]  }
   0x1 LB: > { %s584_s28 = sadd.s32 4294967295, %s661_s27   ;;  %p588_p0 = scmp.ge.s32.totalorder %s661_s27, 1  ;;  %s661_s27 = sphi %s711_s27, %s18_s27  }
   0x2   : > { %p270_p1 = scmp.lt.s32.totalorder %s661_s27, 3 }
   0x4   : > { %p271_p2 = pnand %p588_p0, %p270_p1 }
   0x5   : > { %p306_p3 = scmp.lt.s32.totalorder (!%p271_p2), %s584_s28, 1 }
   0x6   : > { %274 = sbr.rel (%p271_p2) target bundleno = 730 (0x2da), region = 52 }
   0xb   : > { %v647_v0 = vld [vmem:[%s773_s2 + $0x8] sm:$0xff]   ;;  %v663_v1 = vmov 0.0   ;;  %v648_v2 = vld [vmem:[%s773_s2] sm:$0xff]   ;;  %vm664_vm0 = vmmov 0   ;;  %v649_v3 = vld [vmem:[%s775_s4 + $0x18] sm:$0xff]   ;;  %s781_s28 = smov (!%p306_p3, %s584_s28), 1 }
   0xc   : > { %614 = vmatprep.subr.bf16.mxu0 %v663_v1  ;;  %622 = vmatprep.subr.bf16.mxu1 %v663_v1  ;;  %v650_v4 = vld [vmem:[%s775_s4 + $0x10] sm:$0xff]   ;;  %s589_s15 = sshll.u32 %s781_s28, 2  ;;  %vm343_vm1 = vcmask 261120   ;;  %v651_v6 = vld [vmem:[%s775_s4 + $0x8] sm:$0xff]   ;;  %v652_v7 = vld [vmem:[%s775_s4] sm:$0xff]   ;;  %vm428_vm2 = vcmask 523264  }
   0xd   : > { %615 = vmatpush3.bf16.msra.mxu0 %v647_v0  ;;  %618 = vmatprep.mubr.msk.bf16.mxu0 %vm664_vm0, %v663_v1  ;;  %s309_s18 = scalar_lea.vmem %s771_s0, %s589_s15  ;;  %v592_v8 = vld [vmem:[%s774_s3] ss:$0 sm:$0xff]  ;;  %vm474_vm3 = vcmask 260096   ;;  %s590_s29 = sshll.u32 %s781_s28, 3  ;;  %v665_v25 = vmov 0   ;;  %vm513_vm4 = vcmask 257024  }
   0xe   : > { %616 = vmatprep.subr.bf16.mxu0 %v663_v1  ;;  %630 = vmatprep.mubr.msk.bf16.mxu1 %vm664_vm0, %v663_v1  ;;  %v319_v5 = vld [vmem:[%s309_s18] sm:$0xf]  ;;  %s313_s10 = scalar_lea.vmem %s772_s1, %s590_s29  ;;  %s317_s18 = scalar_lea.vmem %s779_s8, %s589_s15  ;;  %vm514_vm5 = vsmask.f32 3328 }
   0xf   : > { %623 = vmatpush3.bf16.msra.mxu1 %v649_v3  ;;  %v596_v16 = vld [vmem:[%s776_s5] ss:$0 sm:$0xff]  ;;  %v472_v17 = vunpack.c.l.bf16 %v319_v5  ;;  %645 = vset.pattern.permute.xlu1 %v665_v25  ;;  %vm515_vm6 = vmand %vm513_vm4, %vm514_vm5 }
  0x10   : > { %624 = vmatprep.subr.bf16.mxu1 %v663_v1  ;;  %646 = vset.pattern.permute.xlu0 %v665_v25  ;;  %v505_v26 = vld [vmem:[%s313_s10] sm:$0x7f] }
  0x11   : > { %617 = vmatpush3.bf16.msra.mxu0 %v648_v2  ;;  %508 = vperm.xlu1 %645, %v505_v26   ;;  %v602_v36 = vld [vmem:[%s777_s6] ss:$0 sm:$0xff] }
  0x12   : > { %v603_v38 = vld [vmem:[%s778_s7] ss:$0 sm:$0xff] }
  0x13   : > { %625 = vmatpush3.bf16.msra.mxu1 %v650_v4  ;;  %v516_v43 = vld [vmem:[%s317_s18] sm:$0xf] }
  0x14   : > { %619 = vmatmul.mubr.msk.bf16.vlgmr.msra.gmra.mxu0 %vm343_vm1, %v319_v5  ;;  %626 = vmatprep.subr.bf16.mxu1 %v663_v1 }
  0x17   : > { %627 = vmatpush3.bf16.msra.mxu1 %v651_v6 }
  0x18   : > { %628 = vmatprep.subr.bf16.mxu1 %v663_v1 }
  0x1b   : > { %629 = vmatpush3.bf16.msra.mxu1 %v652_v7 }
  0x8c   : > { %v509_v40 = vpop.permute.xlu1 %508 }
  0xd4   : > { %v381_v9 = vpop.f32.mrf.mxu0 }
  0xd5   : > { %v382_v10 = vadd.f32 %v592_v8, %v381_v9 }
  0xd6   : > { %v620_v11 = vpop.f32.mrf.mxu0 }
  0xd7   : > { %v387_v12 = vmax.f32 %v382_v10, 0.0 }
  0xd8   : > { %v384_v13 = vpop.f32.mrf.mxu0 }
  0xd9   : > { %v388_v14 = vpack.c.bf16 %v387_v12, %v387_v12 }
  0xda   : > { %v621_v15 = vpop.f32.mrf.mxu0 }
  0xdb   : > { %631 = vmatmul.mubr.msk.bf16.vlgmr.msra.gmra.mxu1 %vm428_vm2, %v388_v14 }
 0x19b   : > { %v466_v18 = vpop.f32.mrf.mxu1 }
 0x19c   : > { %v467_v19 = vadd.f32 %v596_v16, %v466_v18 }
 0x19d   : > { %v632_v20 = vpop.f32.mrf.mxu1 }
 0x19e   : > { %v473_v21 = vadd.f32 %v472_v17, %v467_v19 }
 0x19f   : > { %v469_v22 = vpop.f32.mrf.mxu1 }
 0x1a0   : > { %v475_v23 = vsel %vm474_vm3, %v473_v21, 0.0 }
 0x1a1   : > { %476 = vadd.xlane.f32.xlu0 %v475_v23  ;;  %v633_v24 = vpop.f32.mrf.mxu1 }
 0x22a   : > { %v477_v27 = vpop.xlane.xlu0 %476 }
 0x22b   : > { %v479_v28 = vmul.f32 0.03125, %v477_v27 }
 0x22d   : > { %v480_v29 = vsub.f32 %v473_v21, %v479_v28 }
 0x22f   : > { %v481_v30 = vmul.f32 %v480_v29, %v480_v29 }
 0x231   : > { %v482_v31 = vsel %vm474_vm3, %v481_v30, 0.0 }
 0x232   : > { %483 = vadd.xlane.f32.xlu0 %v482_v31 }
 0x2bb   : > { %v484_v32 = vpop.xlane.xlu0 %483 }
 0x2bc   : > { %v485_v33 = vmul.f32 0.03125, %v484_v32 }
 0x2be   : > { %v486_v34 = vadd.f32 1e-05, %v485_v33 }
 0x2c0   : > { %653 = vrsqrt.f32 %v486_v34 }
 0x2cd   : > { %v654_v35 = vpop.eup %653 }
 0x2ce   : > { %v488_v37 = vmul.f32 %v654_v35, %v480_v29 }
 0x2d0   : > { %v496_v39 = vmul.f32 %v602_v36, %v488_v37 }
 0x2d2   : > { %v504_v41 = vadd.f32 %v603_v38, %v496_v39 }
 0x2d4   : > { %v511_v42 = vmul.f32 %v509_v40, %v504_v41 }
 0x2d6   : > { %v512_v44 = vpack.c.bf16 %v511_v42, %v511_v42 }
 0x2d8   : > { %v517_v45 = vsel %vm515_vm6, %v512_v44, %v516_v43 }
 0x2d9   : > { %518 = vst [vmem:[%s317_s18] sm:$0xf] %v517_v45 }
 0x2da PF: > { %s18_s27 = sadd.s32 1, %s661_s27  }
 0x2db   : > { %p15_p4 = scmp.ge.s32.totalorder %s18_s27, 4  }
 0x2dd   :  { %17 = sbr.rel (!%p15_p4) target bundleno = 1 (0x1), region = 85 }

</bundles_post_ra>
